<compile_context>
chip_gen: v5e
topology: v5e:2x2
jax: 0.10.0
libtpu: 0.0.40
codegen_flags: <defaults>
</compile_context>

<pallas_src>
import functools

import jax
import jax.numpy as jnp
from jax.experimental import pallas as pl
from jax.experimental.pallas import tpu as pltpu


# ----------------------------------------------------------------------------
# Deterministic parameter initialization (mirrors layer_init: orthogonal weight,
# constant-zero bias).
# ----------------------------------------------------------------------------
def orthogonal_init(key, out_features, in_features, gain):
    """PyTorch-style nn.init.orthogonal_ for a [out, in] weight, scaled by gain."""
    rows, cols = out_features, in_features
    big, small = max(rows, cols), min(rows, cols)
    a = jax.random.normal(key, (big, small), dtype=jnp.float32)
    q, r = jnp.linalg.qr(a)
    q = q * jnp.sign(jnp.diagonal(r))[None, :]   # make decomposition unique
    w = q if rows >= cols else q.T
    return gain * w  # [out, in]


def make_critic_params(key, state_dim, fc_dims):
    """Weights as [in, out] (transposed from PyTorch), biases as [1, out]."""
    dims = [state_dim] + list(fc_dims) + [1]
    stds = [float(jnp.sqrt(2.0))] * len(fc_dims) + [1.0]
    params = []
    for i, (din, dout) in enumerate(zip(dims[:-1], dims[1:])):
        key, sub = jax.random.split(key)
        w_torch = orthogonal_init(sub, dout, din, stds[i])  # [out, in]
        w = jnp.asarray(w_torch.T, dtype=jnp.float32)       # [in, out]
        b = jnp.zeros((1, dout), dtype=jnp.float32)         # bias_const = 0.0
        params.append((w, b))
    return params


def _round_up(x, m):
    return (x + m - 1) // m * m


def _default_block_m(batch, cap=1024):
    """128-aligned batch tile.  Single tile for small batches; for big batches at
    least two tiles with an even tile count (v7x has 2 TensorCores)."""
    if batch <= 256:
        # Single tile; MXU pads M to 128 internally, so rounding up is nearly free
        # and keeps the lane-dense output store an unmasked vst.
        return _round_up(batch, 128)
    target = min(cap, _round_up(pl.cdiv(batch, 2), 128))
    num_tiles = pl.cdiv(_round_up(batch, 128), target)
    if num_tiles > 1 and num_tiles % 2 == 1:
        num_tiles += 1                       # even split across 2 TensorCores
    return _round_up(pl.cdiv(batch, num_tiles), 128)


def _default_tanh_dtype(compute_dtype):
    """bf16 tanh on chips with a bf16 EUP (v6e/v7x); f32 otherwise (v5e and older)."""
    if jnp.dtype(compute_dtype) == jnp.dtype(jnp.float32):
        return jnp.float32
    try:
        kind = jax.devices()[0].device_kind.lower()
    except Exception:  # pragma: no cover - be conservative if query fails
        return jnp.float32
    if any(f"v{n}" in kind for n in (2, 3, 4, 5)):
        return jnp.float32
    return jnp.bfloat16


# ----------------------------------------------------------------------------
# Pallas kernel: full MLP forward for one batch tile.
# ----------------------------------------------------------------------------
def critic_kernel(x_ref, w1_ref, b1_ref, w2_ref, b2_ref, w3_ref, b3_ref, out_ref,
                  *, compute_dtype, tanh_dtype):
    x = x_ref[...]                                                   # [bm, state_dim]
    # Layer 1: MXU matmul with f32 accumulation; bias add in f32; tanh on the EUP
    # (bf16 on v6e/v7x, f32 on v5e).
    pre1 = jnp.dot(x, w1_ref[...], preferred_element_type=jnp.float32) + b1_ref[...]
    h1 = jnp.tanh(pre1.astype(tanh_dtype)).astype(compute_dtype)    # [bm, d1]
    # Layer 2.
    pre2 = jnp.dot(h1, w2_ref[...], preferred_element_type=jnp.float32) + b2_ref[...]
    h2 = jnp.tanh(pre2.astype(tanh_dtype))                          # [bm, d2]
    # Layer 3 (256 -> 1): VPU multiply + cross-lane reduction (XLU) instead of an
    # N=1 MXU matmul; result is lane-dense so the store is an unmasked vst.
    v = jnp.sum(h2.astype(jnp.float32) * w3_ref[...], axis=-1) + b3_ref[0, 0]  # [bm]
    out_ref[...] = v[None, None, :].astype(out_ref.dtype)           # [1, 1, bm]


@functools.partial(jax.jit, static_argnames=("block_m", "compute_dtype", "tanh_dtype"))
def _critic_forward_impl(state, params, *, block_m, compute_dtype, tanh_dtype):
    (w1, b1), (w2, b2), (w3, b3) = params
    B, state_dim = state.shape
    d1 = w1.shape[1]
    d2 = w2.shape[1]

    B_pad = _round_up(B, block_m)
    num_tiles = B_pad // block_m

    # MXU operands in compute_dtype (default bf16); ragged batch zero-padded.
    x = state.astype(compute_dtype)
    if B_pad != B:
        x = jnp.pad(x, ((0, B_pad - B), (0, 0)))

    w1c = w1.astype(compute_dtype)
    w2c = w2.astype(compute_dtype)
    b1f = b1.astype(jnp.float32)
    b2f = b2.astype(jnp.float32)
    w3_row = w3.reshape(1, d2).astype(jnp.float32)   # [1, d2] row for VPU broadcast
    b3_s = b3.reshape(1, 1).astype(jnp.float32)      # scalar bias -> SMEM

    rep = lambda i: (0, 0)  # replicated operands (weights resident in VMEM)
    kernel = functools.partial(critic_kernel,
                               compute_dtype=compute_dtype,
                               tanh_dtype=tanh_dtype)

    out_slab = pl.pallas_call(
        kernel,
        out_shape=jax.ShapeDtypeStruct((num_tiles, 1, block_m), jnp.float32),
        grid=(num_tiles,),
        in_specs=[
            pl.BlockSpec((block_m, state_dim), lambda i: (i, 0)),  # x: tiled over batch
            pl.BlockSpec((state_dim, d1), rep),                    # w1
            pl.BlockSpec((1, d1), rep),                            # b1
            pl.BlockSpec((d1, d2), rep),                           # w2
            pl.BlockSpec((1, d2), rep),                            # b2
            pl.BlockSpec((1, d2), rep),                            # w3 (as a row)
            pl.BlockSpec(memory_space=pltpu.MemorySpace.SMEM),     # b3 scalar in SMEM
        ],
        out_specs=pl.BlockSpec((1, 1, block_m), lambda i: (i, 0, 0)),  # lane-dense slab
        compiler_params=pltpu.CompilerParams(
            dimension_semantics=("parallel",),
        ),
    )(x, w1c, b1f, w2c, b2f, w3_row, b3_s)

    return out_slab.reshape(B_pad, 1)[:B]


def critic_forward(state, params, *, block_m=None, compute_dtype=jnp.bfloat16,
                   tanh_dtype=None):
    """state: [B, state_dim] float32 -> value: [B, 1] float32."""
    B = state.shape[0]
    if block_m is None:
        block_m = _default_block_m(B)
    # 128-aligned tiles satisfy both f32 (8,·) and bf16 (16,·) sublane packing and
    # the MXU M granule; never tile wider than the (128-rounded) batch.
    block_m = min(_round_up(int(block_m), 128), _round_up(B, 128))
    if tanh_dtype is None:
        tanh_dtype = _default_tanh_dtype(compute_dtype)
    return _critic_forward_impl(state, params,
                                block_m=block_m,
                                compute_dtype=jnp.dtype(compute_dtype),
                                tanh_dtype=jnp.dtype(tanh_dtype))


# Pure-JAX reference for verification.
def critic_forward_ref(state, params):
    (w1, b1), (w2, b2), (w3, b3) = params
    h1 = jnp.tanh(state @ w1 + b1)
    h2 = jnp.tanh(h1 @ w2 + b2)
    return h2 @ w3 + b3


if __name__ == "__main__":
    key = jax.random.PRNGKey(0)

    # Small shapes consistent with the module: state_dim=16, fc_dims=[256, 256].
    # B deliberately not a multiple of 128 to exercise the ragged-batch path.
    B = 200
    state_dim = 16
    fc_dims = [256, 256]

    key, pkey, xkey = jax.random.split(key, 3)
    params = make_critic_params(pkey, state_dim, fc_dims)
    state = jax.random.normal(xkey, (B, state_dim), dtype=jnp.float32)

    ref = critic_forward_ref(state, params)

    # f32 path (tight tolerance): default single tile + explicit 128-row tiles
    # (exercises batch padding and a multi-step "parallel" grid).
    v_f32 = jax.block_until_ready(
        critic_forward(state, params, compute_dtype=jnp.float32))
    v_f32_tiled = jax.block_until_ready(
        critic_forward(state, params, block_m=128, compute_dtype=jnp.float32))
    for v in (v_f32, v_f32_tiled):
        assert v.shape == (B, 1)
        assert jnp.allclose(v, ref, atol=1e-4, rtol=1e-4), "f32 mismatch vs. reference"

    # Default bf16-MXU-operand path (looser tolerance for bf16 rounding).
    v_bf16 = jax.block_until_ready(critic_forward(state, params))
    assert v_bf16.shape == (B, 1)
    assert jnp.allclose(v_bf16, ref, atol=5e-2, rtol=5e-2), "bf16 mismatch vs. reference"

    print("KERNEL_OK")
</pallas_src>

<mosaic_0001>
module attributes {stable_mosaic.version = 11 : i64} {
  func.func @critic_kernel(%arg0: i32, %arg1: memref<256x16xf32, #tpu.memory_space<vmem>>, %arg2: memref<16x256xf32, #tpu.memory_space<vmem>>, %arg3: memref<1x256xf32, #tpu.memory_space<vmem>>, %arg4: memref<256x256xf32, #tpu.memory_space<vmem>>, %arg5: memref<1x256xf32, #tpu.memory_space<vmem>>, %arg6: memref<1x256xf32, #tpu.memory_space<vmem>>, %arg7: memref<1x1xf32, #tpu.memory_space<smem>>, %arg8: memref<1x1x256xf32, #tpu.memory_space<vmem>>) attributes {dimension_semantics = [#tpu.dimension_semantics<parallel>], iteration_bounds = array<i64: 1>, scalar_prefetch = 0 : i64, scratch_operands = 0 : i64, tpu.core_type = #tpu.core_type<tc>, window_params = [{transform_indices = @transform_0, window_bounds = array<i64: 256, 16>}, {pipeline_mode = #tpu.pipeline_mode<synchronous>, transform_indices = @transform_1, window_bounds = array<i64: 16, 256>}, {pipeline_mode = #tpu.pipeline_mode<synchronous>, transform_indices = @transform_2, window_bounds = array<i64: 1, 256>}, {pipeline_mode = #tpu.pipeline_mode<synchronous>, transform_indices = @transform_3, window_bounds = array<i64: 256, 256>}, {pipeline_mode = #tpu.pipeline_mode<synchronous>, transform_indices = @transform_4, window_bounds = array<i64: 1, 256>}, {pipeline_mode = #tpu.pipeline_mode<synchronous>, transform_indices = @transform_5, window_bounds = array<i64: 1, 256>}, {transform_indices = @transform_6, window_bounds = array<i64: 1, 1>}, {transform_indices = @transform_7, window_bounds = array<i64: 1, 1, 256>}]} {
    %c0 = arith.constant 0 : index
    %c0_0 = arith.constant 0 : index
    %0 = vector.load %arg1[%c0, %c0_0] : memref<256x16xf32, #tpu.memory_space<vmem>>, vector<256x16xf32>
    %c0_1 = arith.constant 0 : index
    %c0_2 = arith.constant 0 : index
    %1 = vector.load %arg2[%c0_1, %c0_2] : memref<16x256xf32, #tpu.memory_space<vmem>>, vector<16x256xf32>
    %cst = arith.constant dense<0.000000e+00> : vector<256x256xf32>
    %2 = tpu.matmul %0, %1, %cst {dimension_numbers = #tpu.dot_dimension_numbers<[1], [0], [0], [1], [0, 0, 1, 1], [], []>} : vector<256x16xf32>, vector<16x256xf32>, vector<256x256xf32> -> vector<256x256xf32>
    %c0_3 = arith.constant 0 : index
    %c0_4 = arith.constant 0 : index
    %3 = vector.load %arg3[%c0_3, %c0_4] : memref<1x256xf32, #tpu.memory_space<vmem>>, vector<1x256xf32>
    %4 = vector.broadcast %3 : vector<1x256xf32> to vector<256x256xf32>
    %5 = arith.addf %2, %4 : vector<256x256xf32>
    %6 = math.tanh %5 : vector<256x256xf32>
    %c0_5 = arith.constant 0 : index
    %c0_6 = arith.constant 0 : index
    %7 = vector.load %arg4[%c0_5, %c0_6] : memref<256x256xf32, #tpu.memory_space<vmem>>, vector<256x256xf32>
    %cst_7 = arith.constant dense<0.000000e+00> : vector<256x256xf32>
    %8 = tpu.matmul %6, %7, %cst_7 {dimension_numbers = #tpu.dot_dimension_numbers<[1], [0], [0], [1], [0, 0, 1, 1], [], []>} : vector<256x256xf32>, vector<256x256xf32>, vector<256x256xf32> -> vector<256x256xf32>
    %c0_8 = arith.constant 0 : index
    %c0_9 = arith.constant 0 : index
    %9 = vector.load %arg5[%c0_8, %c0_9] : memref<1x256xf32, #tpu.memory_space<vmem>>, vector<1x256xf32>
    %10 = vector.broadcast %9 : vector<1x256xf32> to vector<256x256xf32>
    %11 = arith.addf %8, %10 : vector<256x256xf32>
    %12 = math.tanh %11 : vector<256x256xf32>
    %c0_10 = arith.constant 0 : index
    %c0_11 = arith.constant 0 : index
    %13 = vector.load %arg6[%c0_10, %c0_11] : memref<1x256xf32, #tpu.memory_space<vmem>>, vector<1x256xf32>
    %14 = vector.broadcast %13 : vector<1x256xf32> to vector<256x256xf32>
    %15 = arith.mulf %12, %14 : vector<256x256xf32>
    %cst_12 = arith.constant dense<0.000000e+00> : vector<256xf32>
    %16 = vector.multi_reduction <add>, %15, %cst_12 [1] : vector<256x256xf32> to vector<256xf32>
    %c0_13 = arith.constant 0 : index
    %c0_14 = arith.constant 0 : index
    %17 = memref.load %arg7[%c0_13, %c0_14] : memref<1x1xf32, #tpu.memory_space<smem>>
    %18 = vector.broadcast %17 : f32 to vector<256xf32>
    %19 = arith.addf %16, %18 : vector<256xf32>
    %20 = vector.shape_cast %19 : vector<256xf32> to vector<1x1x256xf32>
    %c0_15 = arith.constant 0 : index
    %c0_16 = arith.constant 0 : index
    %c0_17 = arith.constant 0 : index
    %21 = vector.load %arg8[%c0_15, %c0_16, %c0_17] : memref<1x1x256xf32, #tpu.memory_space<vmem>>, vector<1x1x256xf32>
    tpu.vector_store %arg8[%c0_15, %c0_16, %c0_17], %20 {strides = array<i32>} : memref<1x1x256xf32, #tpu.memory_space<vmem>>, vector<1x1x256xf32>,
    return
  }
  func.func @transform_0(%arg0: i32) -> (i32, i32) {
    %c0_i32 = arith.constant 0 : i32
    %c0_i32_0 = arith.constant 0 : i32
    return %arg0, %c0_i32 : i32, i32
  }
  func.func @transform_1(%arg0: i32) -> (i32, i32) {
    %c0_i32 = arith.constant 0 : i32
    %c0_i32_0 = arith.constant 0 : i32
    %c0_i32_1 = arith.constant 0 : i32
    return %c0_i32, %c0_i32_0 : i32, i32
  }
  func.func @transform_2(%arg0: i32) -> (i32, i32) {
    %c0_i32 = arith.constant 0 : i32
    %c0_i32_0 = arith.constant 0 : i32
    %c0_i32_1 = arith.constant 0 : i32
    return %c0_i32, %c0_i32_0 : i32, i32
  }
  func.func @transform_3(%arg0: i32) -> (i32, i32) {
    %c0_i32 = arith.constant 0 : i32
    %c0_i32_0 = arith.constant 0 : i32
    %c0_i32_1 = arith.constant 0 : i32
    return %c0_i32, %c0_i32_0 : i32, i32
  }
  func.func @transform_4(%arg0: i32) -> (i32, i32) {
    %c0_i32 = arith.constant 0 : i32
    %c0_i32_0 = arith.constant 0 : i32
    %c0_i32_1 = arith.constant 0 : i32
    return %c0_i32, %c0_i32_0 : i32, i32
  }
  func.func @transform_5(%arg0: i32) -> (i32, i32) {
    %c0_i32 = arith.constant 0 : i32
    %c0_i32_0 = arith.constant 0 : i32
    %c0_i32_1 = arith.constant 0 : i32
    return %c0_i32, %c0_i32_0 : i32, i32
  }
  func.func @transform_6(%arg0: i32) -> (i32, i32) {
    %c0_i32 = arith.constant 0 : i32
    %c0_i32_0 = arith.constant 0 : i32
    %c0_i32_1 = arith.constant 0 : i32
    return %c0_i32, %c0_i32_0 : i32, i32
  }
  func.func @transform_7(%arg0: i32) -> (i32, i32, i32) {
    %c0_i32 = arith.constant 0 : i32
    %c0_i32_0 = arith.constant 0 : i32
    %c0_i32_1 = arith.constant 0 : i32
    return %arg0, %c0_i32, %c0_i32_0 : i32, i32, i32
  }
}

</mosaic_0001>

<bundles_post_ra>
// kernel: _critic_forward_impl.1
= control target key start
LH: loop header
LB: loop body
LE: loop exit
PB: predicated region body
PF: predicated region fallthrough
CT: control target
= control target key end

     0   :  { %vm69_vm0 = vcmask 130048   ;;  %vm1926_vm1 = vcmask 130112   ;;  %vm1930_vm2 = vcmask 195712   ;;  %vm1934_vm3 = vcmask 261312   ;;  %s3454_s1 = inlined_call_operand.vmem [shape: f32[16,256], index: 1, kind: input, shape index: {}]   ;;  %s3455_s0 = inlined_call_operand.vmem [shape: f32[256,16], index: 0, kind: input, shape index: {}]   ;;  %s3456_s3 = inlined_call_operand.vmem [shape: f32[256,256], index: 3, kind: input, shape index: {}]   ;;  %s3457_s2 = inlined_call_operand.vmem [shape: f32[1,256], index: 2, kind: input, shape index: {}]   ;;  %s3458_s4 = inlined_call_operand.vmem [shape: f32[1,256], index: 4, kind: input, shape index: {}]   ;;  %s3459_s5 = inlined_call_operand.vmem [shape: f32[1,256], index: 5, kind: input, shape index: {}]   ;;  %s3460_s6 = inlined_call_operand.<no memory space> [shape: f32[1,1], index: 6, kind: input, shape index: {}]   ;;  %s3461_s7 = inlined_call_operand.vmem [shape: f32[1,1,256], index: 7, kind: output, shape index: {}]  }
   0x1   :  { %v61_v0 = vld [vmem:[%s3454_s1 + $0x10] sm:$0xff]  ;;  %v62_v1 = vld [vmem:[%s3454_s1 + $0x18] sm:$0xff]  ;;  %v59_v2 = vld [vmem:[%s3454_s1] sm:$0xff]  ;;  %vm1938_vm4 = vcmask 326912   ;;  %vm1942_vm5 = vcmask 392512   ;;  %vm1946_vm6 = vcmask 458112  }
   0x2   :  { %180 = vmatpush.msra.mxu0 %v61_v0  ;;  %293 = vmatpush.msra.mxu1 %v62_v1  ;;  %v60_v3 = vld [vmem:[%s3454_s1 + $0x8] sm:$0xff]  ;;  %v27_v4 = vld [vmem:[%s3455_s0] sm:$0xff]  ;;  %v2431_v5 = vld [vmem:[%s3456_s3 + $0xf8] sm:$0xff]  ;;  %vm1950_vm7 = vcmask 523712   ;;  %vm1954_vm8 = vcmask 589312   ;;  %vm1958_vm9 = vcmask 654912  }
   0x3   :  { %2094 = vmatpush.msra.mxu3 %v62_v1  ;;  %2092 = vmatpush.msra.mxu2 %v61_v0  ;;  %v2436_v6 = vld [vmem:[%s3455_s0 + $0x80] sm:$0xff]  ;;  %v518_v7 = vld [vmem:[%s3456_s3 + $0x1f0] sm:$0xff]  ;;  %v2446_v8 = vld [vmem:[%s3456_s3 + $0xe8] sm:$0xff]  ;;  %vm1962_vm10 = vcmask 720512   ;;  %vm1966_vm11 = vcmask 786112   ;;  %vm1970_vm12 = vcmask 851712  }
   0x4   :  { %181 = vmatpush.msra.mxu0 %v59_v2  ;;  %294 = vmatpush.msra.mxu1 %v60_v3  ;;  %v44_v9 = vld [vmem:[%s3455_s0 + $0x88] sm:$0xff]  ;;  %v519_v10 = vld [vmem:[%s3456_s3 + $0x1f8] sm:$0xff]  ;;  %v486_v11 = vld [vmem:[%s3456_s3 + $0xf0] sm:$0xff]  ;;  %vm1974_vm13 = vcmask 917312   ;;  %vm1978_vm14 = vcmask 982912   ;;  %vm1982_vm15 = vcmask 1048512  }
   0x5   :  { %2028 = vmatmul.msk.f32.vlgmr.msra.gmra.mxu0 %vm69_vm0, %v27_v4  ;;  %2060 = vmatmul.msk.f32.vlgmr.msra.gmra.mxu1 %vm69_vm0, %v27_v4  ;;  %v516_v12 = vld [vmem:[%s3456_s3 + $0x1e0] sm:$0xff]  ;;  %v2467_v13 = vld [vmem:[%s3456_s3 + $0xd8] sm:$0xff]  ;;  %v517_v14 = vld [vmem:[%s3456_s3 + $0x1e8] sm:$0xff] }
   0x6   :  { %752 = vmatpush.msrb.mxu0 %v2431_v5  ;;  %2095 = vmatpush.msra.mxu3 %v60_v3  ;;  %v484_v15 = vld [vmem:[%s3456_s3 + $0xe0] sm:$0xff]  ;;  %v514_v16 = vld [vmem:[%s3456_s3 + $0x1d0] sm:$0xff]  ;;  %v28_v17 = vld [vmem:[%s3455_s0 + $0x8] sm:$0xff] }
   0x7   :  { %2076 = vmatmul.msk.f32.vlgmr.msra.gmra.mxu3 %vm69_vm0, %v2436_v6  ;;  %2093 = vmatpush.msra.mxu2 %v59_v2  ;;  %v482_v18 = vld [vmem:[%s3456_s3 + $0xd0] sm:$0xff]  ;;  %v2489_v19 = vld [vmem:[%s3456_s3 + $0xc8] sm:$0xff]  ;;  %v515_v20 = vld [vmem:[%s3456_s3 + $0x1d8] sm:$0xff] }
   0x8   :  { %639 = vmatpush.msrb.mxu3 %v518_v7  ;;  %753 = vmatpush.msrb.mxu0 %v2446_v8  ;;  %v512_v21 = vld [vmem:[%s3456_s3 + $0x1c0] sm:$0xff]  ;;  %v45_v23 = vld [vmem:[%s3455_s0 + $0x90] sm:$0xff]  ;;  %v2509_v24 = vld [vmem:[%s3456_s3 + $0xb8] sm:$0xff] }
   0x9   :  { %2045 = vmatmul.msk.f32.vlgmr.msra.gmra.mxu2 %vm69_vm0, %v44_v9  ;;  %865 = vmatpush.msrb.mxu1 %v519_v10  ;;  %v480_v22 = vld [vmem:[%s3456_s3 + $0xc0] sm:$0xff]  ;;  %v513_v25 = vld [vmem:[%s3456_s3 + $0x1c8] sm:$0xff]  ;;  %v510_v26 = vld [vmem:[%s3456_s3 + $0x1b0] sm:$0xff] }
   0xa   :  { %526 = vmatpush.msrb.mxu2 %v486_v11  ;;  %640 = vmatpush.msrb.mxu3 %v516_v12  ;;  %v478_v27 = vld [vmem:[%s3456_s3 + $0xb0] sm:$0xff]  ;;  %v511_v28 = vld [vmem:[%s3456_s3 + $0x1b8] sm:$0xff]  ;;  %v2534_v30 = vld [vmem:[%s3456_s3 + $0xa8] sm:$0xff] }
   0xb   :  { %754 = vmatpush.msrb.mxu0 %v2467_v13  ;;  %866 = vmatpush.msrb.mxu1 %v517_v14  ;;  %v29_v29 = vld [vmem:[%s3455_s0 + $0x10] sm:$0xff]  ;;  %v508_v31 = vld [vmem:[%s3456_s3 + $0x1a0] sm:$0xff]  ;;  %v46_v33 = vld [vmem:[%s3455_s0 + $0x98] sm:$0xff] }
   0xc   :  { %527 = vmatpush.msrb.mxu2 %v484_v15  ;;  %641 = vmatpush.msrb.mxu3 %v514_v16  ;;  %v476_v32 = vld [vmem:[%s3456_s3 + $0xa0] sm:$0xff]  ;;  %v509_v34 = vld [vmem:[%s3456_s3 + $0x1a8] sm:$0xff]  ;;  %v30_v35 = vld [vmem:[%s3455_s0 + $0x18] sm:$0xff] }
   0xd   :  { %2029 = vmatmul.msk.f32.gmra.mxu0 %vm69_vm0, %v28_v17  ;;  %2061 = vmatmul.msk.f32.gmra.mxu1 %vm69_vm0, %v28_v17  ;;  %v2559_v36 = vld [vmem:[%s3456_s3 + $0x98] sm:$0xff]  ;;  %v506_v37 = vld [vmem:[%s3456_s3 + $0x190] sm:$0xff]  ;;  %v47_v39 = vld [vmem:[%s3455_s0 + $0xa0] sm:$0xff] }
   0xe   :  { %528 = vmatpush.msrb.mxu2 %v482_v18  ;;  %755 = vmatpush.msrb.mxu0 %v2489_v19  ;;  %v474_v38 = vld [vmem:[%s3456_s3 + $0x90] sm:$0xff]  ;;  %v507_v40 = vld [vmem:[%s3456_s3 + $0x198] sm:$0xff]  ;;  %v31_v41 = vld [vmem:[%s3455_s0 + $0x20] sm:$0xff] }
   0xf   :  { %2077 = vmatmul.msk.f32.gmra.mxu3 %vm69_vm0, %v44_v9  ;;  %867 = vmatpush.msrb.mxu1 %v515_v20  ;;  %v504_v42 = vld [vmem:[%s3456_s3 + $0x180] sm:$0xff]  ;;  %v2587_v43 = vld [vmem:[%s3456_s3 + $0x88] sm:$0xff]  ;;  %v502_v48 = vld [vmem:[%s3456_s3 + $0x170] sm:$0xff] }
  0x10   :  { %642 = vmatpush.msrb.mxu3 %v512_v21  ;;  %529 = vmatpush.msrb.mxu2 %v480_v22  ;;  %v472_v44 = vld [vmem:[%s3456_s3 + $0x80] sm:$0xff]  ;;  %v48_v45 = vld [vmem:[%s3455_s0 + $0xa8] sm:$0xff]  ;;  %v2612_v49 = vld [vmem:[%s3456_s3 + $0x78] sm:$0xff] }
  0x11   :  { %2046 = vmatmul.msk.f32.gmra.mxu2 %vm69_vm0, %v45_v23  ;;  %756 = vmatpush.msrb.mxu0 %v2509_v24  ;;  %v505_v46 = vld [vmem:[%s3456_s3 + $0x188] sm:$0xff]  ;;  %v470_v50 = vld [vmem:[%s3456_s3 + $0x70] sm:$0xff]  ;;  %v503_v52 = vld [vmem:[%s3456_s3 + $0x178] sm:$0xff] }
  0x12   :  { %868 = vmatpush.msrb.mxu1 %v513_v25  ;;  %643 = vmatpush.msrb.mxu3 %v510_v26  ;;  %v32_v47 = vld [vmem:[%s3455_s0 + $0x28] sm:$0xff]  ;;  %v49_v51 = vld [vmem:[%s3455_s0 + $0xb0] sm:$0xff]  ;;  %v500_v54 = vld [vmem:[%s3456_s3 + $0x160] sm:$0xff] }
  0x13   :  { %530 = vmatpush.msrb.mxu2 %v478_v27  ;;  %757 = vmatpush.msrb.mxu0 %v2534_v30  ;;  %v33_v53 = vld [vmem:[%s3455_s0 + $0x30] sm:$0xff]  ;;  %v2637_v55 = vld [vmem:[%s3456_s3 + $0x68] sm:$0xff]  ;;  %v468_v56 = vld [vmem:[%s3456_s3 + $0x60] sm:$0xff] }
  0x14   :  { %869 = vmatpush.msrb.mxu1 %v511_v28  ;;  %644 = vmatpush.msrb.mxu3 %v508_v31  ;;  %v50_v57 = vld [vmem:[%s3455_s0 + $0xb8] sm:$0xff]  ;;  %v501_v58 = vld [vmem:[%s3456_s3 + $0x168] sm:$0xff]  ;;  %v498_v60 = vld [vmem:[%s3456_s3 + $0x150] sm:$0xff] }
  0x15   :  { %2030 = vmatmul.msk.f32.gmra.mxu0 %vm69_vm0, %v29_v29  ;;  %2062 = vmatmul.msk.f32.gmra.mxu1 %vm69_vm0, %v29_v29  ;;  %v34_v59 = vld [vmem:[%s3455_s0 + $0x38] sm:$0xff]  ;;  %v466_v61 = vld [vmem:[%s3456_s3 + $0x50] sm:$0xff]  ;;  %v51_v63 = vld [vmem:[%s3455_s0 + $0xc0] sm:$0xff] }
  0x16   :  { %531 = vmatpush.msrb.mxu2 %v476_v32  ;;  %870 = vmatpush.msrb.mxu1 %v509_v34  ;;  %v2665_v62 = vld [vmem:[%s3456_s3 + $0x58] sm:$0xff]  ;;  %v35_v1 = vld [vmem:[%s3455_s0 + $0x40] sm:$0xff]  ;;  %v2690_v4 = vld [vmem:[%s3456_s3 + $0x48] sm:$0xff] }
  0x17   :  { %2078 = vmatmul.msk.f32.gmra.mxu3 %vm69_vm0, %v45_v23  ;;  %758 = vmatpush.msrb.mxu0 %v2559_v36  ;;  %v499_v0 = vld [vmem:[%s3456_s3 + $0x158] sm:$0xff]  ;;  %v496_v2 = vld [vmem:[%s3456_s3 + $0x140] sm:$0xff]  ;;  %v52_v7 = vld [vmem:[%s3455_s0 + $0xc8] sm:$0xff] }
  0x18   :  { %645 = vmatpush.msrb.mxu3 %v506_v37  ;;  %532 = vmatpush.msrb.mxu2 %v474_v38  ;;  %v464_v3 = vld [vmem:[%s3456_s3 + $0x40] sm:$0xff]  ;;  %v497_v9 = vld [vmem:[%s3456_s3 + $0x148] sm:$0xff]  ;;  %v462_v11 = vld [vmem:[%s3456_s3 + $0x30] sm:$0xff] }
  0x19   :  { %2047 = vmatmul.msk.f32.gmra.mxu2 %vm69_vm0, %v46_v33  ;;  %871 = vmatpush.msrb.mxu1 %v507_v40  ;;  %v36_v10 = vld [vmem:[%s3455_s0 + $0x48] sm:$0xff]  ;;  %v494_v12 = vld [vmem:[%s3456_s3 + $0x130] sm:$0xff]  ;;  %v2715_v14 = vld [vmem:[%s3456_s3 + $0x38] sm:$0xff] }
  0x1a   :  { %646 = vmatpush.msrb.mxu3 %v504_v42  ;;  %759 = vmatpush.msrb.mxu0 %v2587_v43  ;;  %v53_v15 = vld [vmem:[%s3455_s0 + $0xd0] sm:$0xff]  ;;  %v495_v16 = vld [vmem:[%s3456_s3 + $0x138] sm:$0xff]  ;;  %v460_v18 = vld [vmem:[%s3456_s3 + $0x20] sm:$0xff] }
  0x1b   :  { %533 = vmatpush.msrb.mxu2 %v472_v44  ;;  %872 = vmatpush.msrb.mxu1 %v505_v46  ;;  %v37_v17 = vld [vmem:[%s3455_s0 + $0x50] sm:$0xff]  ;;  %v492_v20 = vld [vmem:[%s3456_s3 + $0x120] sm:$0xff]  ;;  %v2740_v21 = vld [vmem:[%s3456_s3 + $0x28] sm:$0xff] }
  0x1c   :  { %647 = vmatpush.msrb.mxu3 %v502_v48  ;;  %760 = vmatpush.msrb.mxu0 %v2612_v49  ;;  %v54_v22 = vld [vmem:[%s3455_s0 + $0xd8] sm:$0xff]  ;;  %v493_v23 = vld [vmem:[%s3456_s3 + $0x128] sm:$0xff]  ;;  %v458_v26 = vld [vmem:[%s3456_s3 + $0x10] sm:$0xff] }
  0x1d   :  { %2031 = vmatmul.msk.f32.gmra.mxu0 %vm69_vm0, %v30_v35  ;;  %2063 = vmatmul.msk.f32.gmra.mxu1 %vm69_vm0, %v30_v35  ;;  %v38_v25 = vld [vmem:[%s3455_s0 + $0x58] sm:$0xff]  ;;  %v490_v27 = vld [vmem:[%s3456_s3 + $0x110] sm:$0xff]  ;;  %v55_v29 = vld [vmem:[%s3455_s0 + $0xe0] sm:$0xff] }
  0x1e   :  { %534 = vmatpush.msrb.mxu2 %v470_v50  ;;  %873 = vmatpush.msrb.mxu1 %v503_v52  ;;  %v2765_v28 = vld [vmem:[%s3456_s3 + $0x18] sm:$0xff]  ;;  %v39_v31 = vld [vmem:[%s3455_s0 + $0x60] sm:$0xff]  ;;  %v56_v32 = vld [vmem:[%s3455_s0 + $0xe8] sm:$0xff] }
  0x1f   :  { %2079 = vmatmul.msk.f32.gmra.mxu3 %vm69_vm0, %v46_v33  ;;  %761 = vmatpush.msrb.mxu0 %v2637_v55  ;;  %v491_v33 = vld [vmem:[%s3456_s3 + $0x118] sm:$0xff]  ;;  %v456_v34 = vld [vmem:[%s3456_s3] sm:$0xff]  ;;  %v40_v37 = vld [vmem:[%s3455_s0 + $0x68] sm:$0xff] }
  0x20   :  { %648 = vmatpush.msrb.mxu3 %v500_v54  ;;  %535 = vmatpush.msrb.mxu2 %v468_v56  ;;  %v488_v35 = vld [vmem:[%s3456_s3 + $0x100] sm:$0xff]  ;;  %v489_v38 = vld [vmem:[%s3456_s3 + $0x108] sm:$0xff]  ;;  %v57_v40 = vld [vmem:[%s3455_s0 + $0xf0] sm:$0xff] }
  0x21   :  { %2048 = vmatmul.msk.f32.gmra.mxu2 %vm69_vm0, %v47_v39  ;;  %874 = vmatpush.msrb.mxu1 %v501_v58 }
  0x22   :  { %649 = vmatpush.msrb.mxu3 %v498_v60  ;;  %536 = vmatpush.msrb.mxu2 %v466_v61 }
  0x23   :  { %762 = vmatpush.msrb.mxu0 %v2665_v62  ;;  %875 = vmatpush.msrb.mxu1 %v499_v0 }
  0x24   :  { %650 = vmatpush.msrb.mxu3 %v496_v2  ;;  %537 = vmatpush.msrb.mxu2 %v464_v3 }
  0x25   :  { %2032 = vmatmul.msk.f32.gmra.mxu0 %vm69_vm0, %v31_v41  ;;  %2064 = vmatmul.msk.f32.gmra.mxu1 %vm69_vm0, %v31_v41 }
  0x26   :  { %763 = vmatpush.msrb.mxu0 %v2690_v4  ;;  %876 = vmatpush.msrb.mxu1 %v497_v9 }
  0x27   :  { %2080 = vmatmul.msk.f32.gmra.mxu3 %vm69_vm0, %v47_v39  ;;  %538 = vmatpush.msrb.mxu2 %v462_v11  ;;  %v457_v39 = vld [vmem:[%s3456_s3 + $0x8] sm:$0xff] }
  0x28   :  { %651 = vmatpush.msrb.mxu3 %v494_v12  ;;  %764 = vmatpush.msrb.mxu0 %v2715_v14 }
  0x29   :  { %2049 = vmatmul.msk.f32.gmra.mxu2 %vm69_vm0, %v48_v45  ;;  %877 = vmatpush.msrb.mxu1 %v495_v16 }
  0x2a   :  { %539 = vmatpush.msrb.mxu2 %v460_v18  ;;  %652 = vmatpush.msrb.mxu3 %v492_v20 }
  0x2b   :  { %765 = vmatpush.msrb.mxu0 %v2740_v21  ;;  %878 = vmatpush.msrb.mxu1 %v493_v23 }
  0x2c   :  { %540 = vmatpush.msrb.mxu2 %v458_v26  ;;  %653 = vmatpush.msrb.mxu3 %v490_v27 }
  0x2d   :  { %2033 = vmatmul.msk.f32.gmra.mxu0 %vm69_vm0, %v32_v47  ;;  %2065 = vmatmul.msk.f32.gmra.mxu1 %vm69_vm0, %v32_v47 }
  0x2e   :  { %766 = vmatpush.msrb.mxu0 %v2765_v28  ;;  %879 = vmatpush.msrb.mxu1 %v491_v33 }
  0x2f   :  { %2081 = vmatmul.msk.f32.gmra.mxu3 %vm69_vm0, %v48_v45  ;;  %541 = vmatpush.msrb.mxu2 %v456_v34 }
  0x30   :  { %654 = vmatpush.msrb.mxu3 %v488_v35  ;;  %880 = vmatpush.msrb.mxu1 %v489_v38 }
  0x31   :  { %2050 = vmatmul.msk.f32.gmra.mxu2 %vm69_vm0, %v49_v51  ;;  %767 = vmatpush.msrb.mxu0 %v457_v39 }
  0x32   :  { %2096 = vmatpush.msra.mxu2 %v2431_v5  ;;  %v41_v5 = vld [vmem:[%s3455_s0 + $0x70] sm:$0xff] }
  0x34   :  { %2097 = vmatpush.msra.mxu2 %v2446_v8  ;;  %v58_v8 = vld [vmem:[%s3455_s0 + $0xf8] sm:$0xff] }
  0x35   :  { %2034 = vmatmul.msk.f32.gmra.mxu0 %vm69_vm0, %v33_v53  ;;  %2066 = vmatmul.msk.f32.gmra.mxu1 %vm69_vm0, %v33_v53 }
  0x36   :  { %2098 = vmatpush.msra.mxu2 %v2467_v13  ;;  %v42_v13 = vld [vmem:[%s3455_s0 + $0x78] sm:$0xff] }
  0x37   :  { %2082 = vmatmul.msk.f32.gmra.mxu3 %vm69_vm0, %v49_v51 }
  0x38   :  { %2099 = vmatpush.msra.mxu2 %v2489_v19  ;;  %v63_v19 = vld [vmem:[%s3457_s2] sm:$0x3] }
  0x39   :  { %2051 = vmatmul.msk.f32.gmra.mxu2 %vm69_vm0, %v50_v57 }
  0x3a   :  { %2100 = vmatpush.msra.mxu2 %v2509_v24  ;;  %v2837_v24 = vperm.slane %v63_v19, 0 }
  0x3c   :  { %2101 = vmatpush.msra.mxu2 %v2534_v30  ;;  %v2839_v30 = vperm.slane %v63_v19, 1 }
  0x3d   :  { %2035 = vmatmul.msk.f32.gmra.mxu0 %vm69_vm0, %v34_v59  ;;  %2067 = vmatmul.msk.f32.gmra.mxu1 %vm69_vm0, %v34_v59 }
  0x3e   :  { %2102 = vmatpush.msra.mxu2 %v2559_v36 }
  0x3f   :  { %2083 = vmatmul.msk.f32.gmra.mxu3 %vm69_vm0, %v50_v57 }
  0x40   :  { %2103 = vmatpush.msra.mxu2 %v2587_v43 }
  0x41   :  { %2052 = vmatmul.msk.f32.gmra.mxu2 %vm69_vm0, %v51_v63 }
  0x42   :  { %2104 = vmatpush.msra.mxu2 %v2612_v49 }
  0x44   :  { %2105 = vmatpush.msra.mxu2 %v2637_v55 }
  0x45   :  { %2036 = vmatmul.msk.f32.gmra.mxu0 %vm69_vm0, %v35_v1  ;;  %2068 = vmatmul.msk.f32.gmra.mxu1 %vm69_vm0, %v35_v1 }
  0x46   :  { %2106 = vmatpush.msra.mxu2 %v2665_v62 }
  0x47   :  { %2084 = vmatmul.msk.f32.gmra.mxu3 %vm69_vm0, %v51_v63 }
  0x48   :  { %2107 = vmatpush.msra.mxu2 %v2690_v4 }
  0x49   :  { %2053 = vmatmul.msk.f32.gmra.mxu2 %vm69_vm0, %v52_v7 }
  0x4a   :  { %2108 = vmatpush.msra.mxu2 %v2715_v14 }
  0x4c   :  { %2109 = vmatpush.msra.mxu2 %v2740_v21 }
  0x4d   :  { %2037 = vmatmul.msk.f32.gmra.mxu0 %vm69_vm0, %v36_v10  ;;  %2069 = vmatmul.msk.f32.gmra.mxu1 %vm69_vm0, %v36_v10 }
  0x4e   :  { %2110 = vmatpush.msra.mxu2 %v2765_v28 }
  0x4f   :  { %2085 = vmatmul.msk.f32.gmra.mxu3 %vm69_vm0, %v52_v7 }
  0x50   :  { %2111 = vmatpush.msra.mxu2 %v457_v39 }
  0x51   :  { %2054 = vmatmul.msk.f32.gmra.mxu2 %vm69_vm0, %v53_v15 }
  0x55   :  { %2038 = vmatmul.msk.f32.gmra.mxu0 %vm69_vm0, %v37_v17  ;;  %2070 = vmatmul.msk.f32.gmra.mxu1 %vm69_vm0, %v37_v17 }
  0x57   :  { %2086 = vmatmul.msk.f32.gmra.mxu3 %vm69_vm0, %v53_v15 }
  0x59   :  { %2055 = vmatmul.msk.f32.gmra.mxu2 %vm69_vm0, %v54_v22 }
  0x5d   :  { %2039 = vmatmul.msk.f32.gmra.mxu0 %vm69_vm0, %v38_v25  ;;  %2071 = vmatmul.msk.f32.gmra.mxu1 %vm69_vm0, %v38_v25 }
  0x5f   :  { %2087 = vmatmul.msk.f32.gmra.mxu3 %vm69_vm0, %v54_v22 }
  0x61   :  { %2056 = vmatmul.msk.f32.gmra.mxu2 %vm69_vm0, %v55_v29 }
  0x65   :  { %2040 = vmatmul.msk.f32.gmra.mxu0 %vm69_vm0, %v39_v31  ;;  %2072 = vmatmul.msk.f32.gmra.mxu1 %vm69_vm0, %v39_v31 }
  0x67   :  { %2088 = vmatmul.msk.f32.gmra.mxu3 %vm69_vm0, %v55_v29 }
  0x69   :  { %2057 = vmatmul.msk.f32.gmra.mxu2 %vm69_vm0, %v56_v32 }
  0x6d   :  { %2041 = vmatmul.msk.f32.gmra.mxu0 %vm69_vm0, %v40_v37  ;;  %2073 = vmatmul.msk.f32.gmra.mxu1 %vm69_vm0, %v40_v37 }
  0x6f   :  { %2089 = vmatmul.msk.f32.gmra.mxu3 %vm69_vm0, %v56_v32 }
  0x71   :  { %2058 = vmatmul.msk.f32.gmra.mxu2 %vm69_vm0, %v57_v40 }
  0x75   :  { %2042 = vmatmul.msk.f32.gmra.mxu0 %vm69_vm0, %v41_v5  ;;  %2074 = vmatmul.msk.f32.gmra.mxu1 %vm69_vm0, %v41_v5 }
  0x77   :  { %2090 = vmatmul.msk.f32.gmra.mxu3 %vm69_vm0, %v57_v40 }
  0x79   :  { %2059 = vmatmul.msk.f32.gmra.mxu2 %vm69_vm0, %v58_v8 }
  0x7d   :  { %2043 = vmatmul.msk.f32.gmra.mxu0 %vm69_vm0, %v42_v13  ;;  %2075 = vmatmul.msk.f32.gmra.mxu1 %vm69_vm0, %v42_v13 }
  0x7f   :  { %2091 = vmatmul.msk.f32.gmra.mxu3 %vm69_vm0, %v58_v8 }
  0x82   :  { %v183_v36 = vpop.f32.mrf.mxu0  ;;  %v296_v41 = vpop.f32.mrf.mxu1 }
  0x83   :  { %v184_v42 = vadd.f32 %v183_v36, %v2837_v24  ;;  %v297_v43 = vadd.f32 %v296_v41, %v2839_v30 }
  0x85   :  { %2116 = vtanh.f32 %v184_v42  ;;  %2044 = vmatmul.msk.f32.gmra.mxu0 %vm69_vm0, %v2436_v6  ;;  %vm2016_vm0 = vcmask 1040384  }
  0x86   :  { %2118 = vtanh.f32 %v297_v43 }
  0x8a   :  { %v186_v44 = vpop.f32.mrf.mxu0  ;;  %v299_v45 = vpop.f32.mrf.mxu1 }
  0x8b   :  { %v2117_v46 = vpop.eup %2116  ;;  %v187_v47 = vadd.f32 %v186_v44, %v2837_v24  ;;  %v300_v48 = vadd.f32 %v299_v45, %v2839_v30  ;;  %v2852_v49 = vpop.f32.mrf.mxu3 }
  0x8c   :  { %v2119_v50 = vpop.eup %2118  ;;  %542 = vmatmul.f32.vlgmr.msrb.gmra.mxu2 %v2117_v46  ;;  %v2854_v51 = vpop.f32.mrf.mxu2 }
  0x8d   :  { %2120 = vtanh.f32 %v187_v47  ;;  %655 = vmatmul.f32.vlgmr.msrb.gmra.mxu3 %v2119_v50  ;;  %881 = vmatmul.f32.vlgmr.msrb.gmra.mxu1 %v2119_v50 }
  0x8e   :  { %2122 = vtanh.f32 %v300_v48  ;;  %768 = vmatmul.f32.vlgmr.msrb.gmra.mxu0 %v2117_v46 }
  0x92   :  { %v189_v6 = vpop.f32.mrf.mxu0  ;;  %v302_v52 = vpop.f32.mrf.mxu1 }
  0x93   :  { %v2121_v53 = vpop.eup %2120  ;;  %v190_v54 = vadd.f32 %v189_v6, %v2837_v24  ;;  %v303_v55 = vadd.f32 %v302_v52, %v2839_v30  ;;  %v2858_v56 = vpop.f32.mrf.mxu3 }
  0x94   :  { %v2123_v57 = vpop.eup %2122  ;;  %545 = vmatmul.f32.gmra.mxu2 %v2121_v53  ;;  %v2860_v58 = vpop.f32.mrf.mxu2 }
  0x95   :  { %2124 = vtanh.f32 %v190_v54  ;;  %658 = vmatmul.f32.gmra.mxu3 %v2123_v57  ;;  %884 = vmatmul.f32.gmra.mxu1 %v2123_v57 }
  0x96   :  { %2126 = vtanh.f32 %v303_v55  ;;  %771 = vmatmul.f32.gmra.mxu0 %v2121_v53 }
  0x9a   :  { %v192_v59 = vpop.f32.mrf.mxu0  ;;  %v305_v60 = vpop.f32.mrf.mxu1 }
  0x9b   :  { %v2125_v61 = vpop.eup %2124  ;;  %v193_v62 = vadd.f32 %v192_v59, %v2837_v24  ;;  %v306_v63 = vadd.f32 %v305_v60, %v2839_v30  ;;  %v2864_v0 = vpop.f32.mrf.mxu3 }
  0x9c   :  { %v2127_v1 = vpop.eup %2126  ;;  %548 = vmatmul.f32.gmra.mxu2 %v2125_v61  ;;  %v2866_v2 = vpop.f32.mrf.mxu2 }
  0x9d   :  { %2128 = vtanh.f32 %v193_v62  ;;  %661 = vmatmul.f32.gmra.mxu3 %v2127_v1  ;;  %887 = vmatmul.f32.gmra.mxu1 %v2127_v1 }
  0x9e   :  { %2130 = vtanh.f32 %v306_v63  ;;  %774 = vmatmul.f32.gmra.mxu0 %v2125_v61 }
  0xa2   :  { %v195_v3 = vpop.f32.mrf.mxu0  ;;  %v308_v4 = vpop.f32.mrf.mxu1 }
  0xa3   :  { %v2129_v7 = vpop.eup %2128  ;;  %v196_v9 = vadd.f32 %v195_v3, %v2837_v24  ;;  %v309_v10 = vadd.f32 %v308_v4, %v2839_v30  ;;  %v2870_v11 = vpop.f32.mrf.mxu3 }
  0xa4   :  { %v2131_v12 = vpop.eup %2130  ;;  %551 = vmatmul.f32.gmra.mxu2 %v2129_v7  ;;  %v2872_v14 = vpop.f32.mrf.mxu2 }
  0xa5   :  { %2132 = vtanh.f32 %v196_v9  ;;  %664 = vmatmul.f32.gmra.mxu3 %v2131_v12  ;;  %890 = vmatmul.f32.gmra.mxu1 %v2131_v12 }
  0xa6   :  { %2134 = vtanh.f32 %v309_v10  ;;  %777 = vmatmul.f32.gmra.mxu0 %v2129_v7 }
  0xaa   :  { %v198_v15 = vpop.f32.mrf.mxu0  ;;  %v311_v16 = vpop.f32.mrf.mxu1 }
  0xab   :  { %v2133_v17 = vpop.eup %2132  ;;  %v199_v18 = vadd.f32 %v198_v15, %v2837_v24  ;;  %v312_v20 = vadd.f32 %v311_v16, %v2839_v30  ;;  %v2876_v21 = vpop.f32.mrf.mxu3 }
  0xac   :  { %v2135_v22 = vpop.eup %2134  ;;  %554 = vmatmul.f32.gmra.mxu2 %v2133_v17  ;;  %v2878_v23 = vpop.f32.mrf.mxu2 }
  0xad   :  { %2136 = vtanh.f32 %v199_v18  ;;  %667 = vmatmul.f32.gmra.mxu3 %v2135_v22  ;;  %893 = vmatmul.f32.gmra.mxu1 %v2135_v22 }
  0xae   :  { %2138 = vtanh.f32 %v312_v20  ;;  %780 = vmatmul.f32.gmra.mxu0 %v2133_v17 }
  0xb2   :  { %v201_v25 = vpop.f32.mrf.mxu0  ;;  %v314_v26 = vpop.f32.mrf.mxu1 }
  0xb3   :  { %v2137_v27 = vpop.eup %2136  ;;  %v202_v28 = vadd.f32 %v201_v25, %v2837_v24  ;;  %v315_v29 = vadd.f32 %v314_v26, %v2839_v30  ;;  %v2882_v31 = vpop.f32.mrf.mxu3 }
  0xb4   :  { %v2139_v32 = vpop.eup %2138  ;;  %557 = vmatmul.f32.gmra.mxu2 %v2137_v27  ;;  %v2884_v33 = vpop.f32.mrf.mxu2 }
  0xb5   :  { %2140 = vtanh.f32 %v202_v28  ;;  %670 = vmatmul.f32.gmra.mxu3 %v2139_v32  ;;  %896 = vmatmul.f32.gmra.mxu1 %v2139_v32 }
  0xb6   :  { %2142 = vtanh.f32 %v315_v29  ;;  %783 = vmatmul.f32.gmra.mxu0 %v2137_v27 }
  0xba   :  { %v204_v34 = vpop.f32.mrf.mxu0  ;;  %v317_v35 = vpop.f32.mrf.mxu1 }
  0xbb   :  { %v2141_v37 = vpop.eup %2140  ;;  %v205_v38 = vadd.f32 %v204_v34, %v2837_v24  ;;  %v318_v39 = vadd.f32 %v317_v35, %v2839_v30  ;;  %v2888_v40 = vpop.f32.mrf.mxu3 }
  0xbc   :  { %v2143_v5 = vpop.eup %2142  ;;  %560 = vmatmul.f32.gmra.mxu2 %v2141_v37  ;;  %v2890_v8 = vpop.f32.mrf.mxu2 }
  0xbd   :  { %2144 = vtanh.f32 %v205_v38  ;;  %673 = vmatmul.f32.gmra.mxu3 %v2143_v5  ;;  %899 = vmatmul.f32.gmra.mxu1 %v2143_v5 }
  0xbe   :  { %2146 = vtanh.f32 %v318_v39  ;;  %786 = vmatmul.f32.gmra.mxu0 %v2141_v37 }
  0xc2   :  { %v207_v13 = vpop.f32.mrf.mxu0  ;;  %v320_v19 = vpop.f32.mrf.mxu1 }
  0xc3   :  { %v2145_v36 = vpop.eup %2144  ;;  %v208_v41 = vadd.f32 %v207_v13, %v2837_v24  ;;  %v321_v42 = vadd.f32 %v320_v19, %v2839_v30  ;;  %v2894_v43 = vpop.f32.mrf.mxu3 }
  0xc4   :  { %v2147_v44 = vpop.eup %2146  ;;  %563 = vmatmul.f32.gmra.mxu2 %v2145_v36  ;;  %v2896_v45 = vpop.f32.mrf.mxu2 }
  0xc5   :  { %2148 = vtanh.f32 %v208_v41  ;;  %676 = vmatmul.f32.gmra.mxu3 %v2147_v44  ;;  %902 = vmatmul.f32.gmra.mxu1 %v2147_v44 }
  0xc6   :  { %2150 = vtanh.f32 %v321_v42  ;;  %789 = vmatmul.f32.gmra.mxu0 %v2145_v36 }
  0xca   :  { %v210_v46 = vpop.f32.mrf.mxu0  ;;  %v323_v47 = vpop.f32.mrf.mxu1 }
  0xcb   :  { %v2149_v48 = vpop.eup %2148  ;;  %v211_v50 = vadd.f32 %v210_v46, %v2837_v24  ;;  %v324_v6 = vadd.f32 %v323_v47, %v2839_v30  ;;  %v2900_v52 = vpop.f32.mrf.mxu3 }
  0xcc   :  { %v2151_v53 = vpop.eup %2150  ;;  %566 = vmatmul.f32.gmra.mxu2 %v2149_v48  ;;  %v2902_v54 = vpop.f32.mrf.mxu2 }
  0xcd   :  { %2152 = vtanh.f32 %v211_v50  ;;  %679 = vmatmul.f32.gmra.mxu3 %v2151_v53  ;;  %905 = vmatmul.f32.gmra.mxu1 %v2151_v53 }
  0xce   :  { %2154 = vtanh.f32 %v324_v6  ;;  %792 = vmatmul.f32.gmra.mxu0 %v2149_v48 }
  0xd2   :  { %v213_v55 = vpop.f32.mrf.mxu0  ;;  %v326_v57 = vpop.f32.mrf.mxu1 }
  0xd3   :  { %v2153_v59 = vpop.eup %2152  ;;  %v214_v60 = vadd.f32 %v213_v55, %v2837_v24  ;;  %v327_v61 = vadd.f32 %v326_v57, %v2839_v30  ;;  %v2906_v62 = vpop.f32.mrf.mxu3 }
  0xd4   :  { %v2155_v63 = vpop.eup %2154  ;;  %569 = vmatmul.f32.gmra.mxu2 %v2153_v59  ;;  %v2908_v1 = vpop.f32.mrf.mxu2 }
  0xd5   :  { %2156 = vtanh.f32 %v214_v60  ;;  %682 = vmatmul.f32.gmra.mxu3 %v2155_v63  ;;  %908 = vmatmul.f32.gmra.mxu1 %v2155_v63  ;;  %v345_v60 = vadd.f32 %v2852_v49, %v2839_v30 }
  0xd6   :  { %2158 = vtanh.f32 %v327_v61  ;;  %795 = vmatmul.f32.gmra.mxu0 %v2153_v59 }
  0xda   :  { %v216_v3 = vpop.f32.mrf.mxu0  ;;  %v329_v4 = vpop.f32.mrf.mxu1 }
  0xdb   :  { %v2157_v7 = vpop.eup %2156  ;;  %v217_v9 = vadd.f32 %v216_v3, %v2837_v24  ;;  %v330_v10 = vadd.f32 %v329_v4, %v2839_v30  ;;  %v2912_v12 = vpop.f32.mrf.mxu3 }
  0xdc   :  { %v2159_v15 = vpop.eup %2158  ;;  %572 = vmatmul.f32.gmra.mxu2 %v2157_v7  ;;  %v2914_v16 = vpop.f32.mrf.mxu2 }
  0xdd   :  { %2160 = vtanh.f32 %v217_v9  ;;  %685 = vmatmul.f32.gmra.mxu3 %v2159_v15  ;;  %911 = vmatmul.f32.gmra.mxu1 %v2159_v15  ;;  %v520_v9 = vld [vmem:[%s3458_s4] sm:$0x3]  ;;  %v235_v15 = vadd.f32 %v2854_v51, %v2837_v24 }
  0xde   :  { %2162 = vtanh.f32 %v330_v10  ;;  %798 = vmatmul.f32.gmra.mxu0 %v2157_v7  ;;  %v2948_v49 = vperm.slane %v520_v9, 1 }
  0xe2   :  { %v219_v17 = vpop.f32.mrf.mxu0  ;;  %v332_v18 = vpop.f32.mrf.mxu1 }
  0xe3   :  { %v2161_v20 = vpop.eup %2160  ;;  %v220_v22 = vadd.f32 %v219_v17, %v2837_v24  ;;  %v333_v25 = vadd.f32 %v332_v18, %v2839_v30  ;;  %v2918_v26 = vpop.f32.mrf.mxu3  ;;  %v348_v17 = vadd.f32 %v2858_v56, %v2839_v30  ;;  %v238_v56 = vadd.f32 %v2860_v58, %v2837_v24 }
  0xe4   :  { %v2163_v27 = vpop.eup %2162  ;;  %575 = vmatmul.f32.gmra.mxu2 %v2161_v20  ;;  %v2920_v28 = vpop.f32.mrf.mxu2 }
  0xe5   :  { %2164 = vtanh.f32 %v220_v22  ;;  %688 = vmatmul.f32.gmra.mxu3 %v2163_v27  ;;  %914 = vmatmul.f32.gmra.mxu1 %v2163_v27 }
  0xe6   :  { %2166 = vtanh.f32 %v333_v25  ;;  %801 = vmatmul.f32.gmra.mxu0 %v2161_v20 }
  0xea   :  { %v222_v29 = vpop.f32.mrf.mxu0  ;;  %v335_v32 = vpop.f32.mrf.mxu1 }
  0xeb   :  { %v2165_v34 = vpop.eup %2164  ;;  %v223_v35 = vadd.f32 %v222_v29, %v2837_v24  ;;  %v336_v37 = vadd.f32 %v335_v32, %v2839_v30  ;;  %v2924_v38 = vpop.f32.mrf.mxu3  ;;  %v2955_v29 = vperm.slane %v520_v9, 0 }
  0xec   :  { %v2167_v39 = vpop.eup %2166  ;;  %578 = vmatmul.f32.gmra.mxu2 %v2165_v34  ;;  %v2926_v5 = vpop.f32.mrf.mxu2 }
  0xed   :  { %2168 = vtanh.f32 %v223_v35  ;;  %691 = vmatmul.f32.gmra.mxu3 %v2167_v39  ;;  %917 = vmatmul.f32.gmra.mxu1 %v2167_v39 }
  0xee   :  { %2170 = vtanh.f32 %v336_v37  ;;  %804 = vmatmul.f32.gmra.mxu0 %v2165_v34  ;;  %v351_v37 = vadd.f32 %v2864_v0, %v2839_v30 }
  0xf2   :  { %v225_v13 = vpop.f32.mrf.mxu0  ;;  %v338_v19 = vpop.f32.mrf.mxu1 }
  0xf3   :  { %v2169_v36 = vpop.eup %2168  ;;  %v226_v41 = vadd.f32 %v225_v13, %v2837_v24  ;;  %v339_v42 = vadd.f32 %v338_v19, %v2839_v30  ;;  %v2930_v44 = vpop.f32.mrf.mxu3 }
  0xf4   :  { %v2171_v46 = vpop.eup %2170  ;;  %581 = vmatmul.f32.gmra.mxu2 %v2169_v36  ;;  %v2934_v55 = vpop.f32.mrf.mxu2 }
  0xf5   :  { %2172 = vtanh.f32 %v226_v41  ;;  %694 = vmatmul.f32.gmra.mxu3 %v2171_v46  ;;  %920 = vmatmul.f32.gmra.mxu1 %v2171_v46  ;;  %v1042_v46 = vld [vmem:[%s3459_s5] sm:$0x3] }
  0xf6   :  { %2174 = vtanh.f32 %v339_v42  ;;  %807 = vmatmul.f32.gmra.mxu0 %v2169_v36 }
  0xfa   :  { %v228_v47 = vpop.f32.mrf.mxu0  ;;  %v341_v48 = vpop.f32.mrf.mxu1 }
  0xfb   :  { %v2173_v50 = vpop.eup %2172  ;;  %v229_v6 = vadd.f32 %v228_v47, %v2837_v24  ;;  %v342_v53 = vadd.f32 %v341_v48, %v2839_v30  ;;  %v2936_v59 = vpop.f32.mrf.mxu3  ;;  %v2966_v47 = vperm.slane %v1042_v46, 0  ;;  %v2968_v48 = vperm.slane %v1042_v46, 1 }
  0xfc   :  { %v2175_v57 = vpop.eup %2174  ;;  %584 = vmatmul.f32.gmra.mxu2 %v2173_v50  ;;  %v2941_v7 = vpop.f32.mrf.mxu2 }
  0xfd   :  { %2176 = vtanh.f32 %v229_v6  ;;  %697 = vmatmul.f32.gmra.mxu3 %v2175_v57  ;;  %923 = vmatmul.f32.gmra.mxu1 %v2175_v57  ;;  %v241_v57 = vadd.f32 %v2866_v2, %v2837_v24 }
  0xfe   :  { %2178 = vtanh.f32 %v342_v53  ;;  %810 = vmatmul.f32.gmra.mxu0 %v2173_v50 }
 0x102   :  { %v231_v61 = vpop.f32.mrf.mxu0 }
 0x103   :  { %v2177_v63 = vpop.eup %2176  ;;  %v232_v3 = vadd.f32 %v231_v61, %v2837_v24  ;;  %v2946_v10 = vpop.f32.mrf.mxu3  ;;  %v354_v61 = vadd.f32 %v2870_v11, %v2839_v30 }
 0x104   :  { %v2179_v4 = vpop.eup %2178  ;;  %587 = vmatmul.f32.gmra.mxu2 %v2177_v63 }
 0x105   :  { %2180 = vtanh.f32 %v232_v3  ;;  %700 = vmatmul.f32.gmra.mxu3 %v2179_v4  ;;  %926 = vmatmul.f32.gmra.mxu1 %v2179_v4 }
 0x106   :  { %2182 = vtanh.f32 %v345_v60  ;;  %813 = vmatmul.f32.gmra.mxu0 %v2177_v63 }
 0x107   :  { %2184 = vtanh.f32 %v235_v15 }
 0x108   :  { %2186 = vtanh.f32 %v348_v17 }
 0x10a   :  { %v882_v18 = vpop.f32.mrf.mxu1 }
 0x10b   :  { %v2181_v20 = vpop.eup %2180  ;;  %v769_v22 = vpop.f32.mrf.mxu0 }
 0x10c   :  { %v2183_v25 = vpop.eup %2182  ;;  %v770_v27 = vadd.f32 %v769_v22, %v2948_v49  ;;  %590 = vmatmul.f32.gmra.mxu2 %v2181_v20 }
 0x10d   :  { %703 = vmatmul.f32.gmra.mxu3 %v2183_v25  ;;  %929 = vmatmul.f32.gmra.mxu1 %v2183_v25  ;;  %v2185_v19 = vpop.eup %2184 }
 0x10e   :  { %v883_v32 = vadd.f32 %v882_v18, %v770_v27  ;;  %816 = vmatmul.f32.gmra.mxu0 %v2181_v20  ;;  %v2187_v41 = vpop.eup %2186 }
 0x10f   :  { %v543_v34 = vpop.f32.mrf.mxu2 }
 0x110   :  { %v544_v51 = vadd.f32 %v543_v34, %v2955_v29  ;;  %v656_v35 = vpop.f32.mrf.mxu3  ;;  %2188 = vtanh.f32 %v883_v32  ;;  %v244_v34 = vadd.f32 %v2872_v14, %v2837_v24 }
 0x112   :  { %v657_v39 = vadd.f32 %v656_v35, %v544_v51  ;;  %v885_v13 = vpop.f32.mrf.mxu1  ;;  %v357_v35 = vadd.f32 %v2876_v21, %v2839_v30 }
 0x113   :  { %v772_v36 = vpop.f32.mrf.mxu0 }
 0x114   :  { %2190 = vtanh.f32 %v657_v39  ;;  %v773_v42 = vadd.f32 %v772_v36, %v2948_v49  ;;  %593 = vmatmul.f32.gmra.mxu2 %v2185_v19 }
 0x115   :  { %2192 = vtanh.f32 %v238_v56  ;;  %706 = vmatmul.f32.gmra.mxu3 %v2187_v41  ;;  %932 = vmatmul.f32.gmra.mxu1 %v2187_v41 }
 0x116   :  { %2194 = vtanh.f32 %v351_v37  ;;  %v886_v58 = vadd.f32 %v885_v13, %v773_v42  ;;  %819 = vmatmul.f32.gmra.mxu0 %v2185_v19  ;;  %v2189_v50 = vpop.eup %2188 }
 0x117   :  { %v546_v0 = vpop.f32.mrf.mxu2  ;;  %v1049_v17 = vmul.f32 %v2189_v50, %v2968_v48 }
 0x118   :  { %v547_v6 = vadd.f32 %v546_v0, %v2955_v29  ;;  %v659_v53 = vpop.f32.mrf.mxu3  ;;  %2196 = vtanh.f32 %v886_v58 }
 0x11a   :  { %v2191_v60 = vpop.eup %2190  ;;  %v660_v63 = vadd.f32 %v659_v53, %v547_v6  ;;  %v888_v3 = vpop.f32.mrf.mxu1  ;;  %v247_v6 = vadd.f32 %v2878_v23, %v2837_v24 }
 0x11b   :  { %v2193_v4 = vpop.eup %2192  ;;  %v775_v9 = vpop.f32.mrf.mxu0  ;;  %v1048_v15 = vmul.f32 %v2191_v60, %v2966_v47 }
 0x11c   :  { %v2195_v18 = vpop.eup %2194  ;;  %2198 = vtanh.f32 %v660_v63  ;;  %v776_v20 = vadd.f32 %v775_v9, %v2948_v49  ;;  %596 = vmatmul.f32.gmra.mxu2 %v2193_v4 }
 0x11d   :  { %2200 = vtanh.f32 %v241_v57  ;;  %709 = vmatmul.f32.gmra.mxu3 %v2195_v18  ;;  %935 = vmatmul.f32.gmra.mxu1 %v2195_v18  ;;  %v1112_v2 = vadd.f32 %v1049_v17, %v1048_v15  ;;  %v360_v57 = vadd.f32 %v2882_v31, %v2839_v30 }
 0x11e   :  { %2202 = vtanh.f32 %v354_v61  ;;  %v889_v11 = vadd.f32 %v888_v3, %v776_v20  ;;  %822 = vmatmul.f32.gmra.mxu0 %v2193_v4  ;;  %v2197_v25 = vpop.eup %2196 }
 0x11f   :  { %v549_v22 = vpop.f32.mrf.mxu2  ;;  %1113 = vadd.xlane.f32.xlu0 %v1112_v2  ;;  %v1051_v36 = vmul.f32 %v2197_v25, %v2968_v48 }
 0x120   :  { %v550_v27 = vadd.f32 %v549_v22, %v2955_v29  ;;  %v662_v32 = vpop.f32.mrf.mxu3  ;;  %2204 = vtanh.f32 %v889_v11  ;;  %v250_v22 = vadd.f32 %v2884_v33, %v2837_v24 }
 0x122   :  { %v2199_v51 = vpop.eup %2198  ;;  %v663_v56 = vadd.f32 %v662_v32, %v550_v27  ;;  %v891_v37 = vpop.f32.mrf.mxu1  ;;  %v363_v27 = vadd.f32 %v2888_v40, %v2839_v30 }
 0x123   :  { %v2201_v39 = vpop.eup %2200  ;;  %v778_v13 = vpop.f32.mrf.mxu0  ;;  %v1050_v19 = vmul.f32 %v2199_v51, %v2966_v47 }
 0x124   :  { %v2203_v41 = vpop.eup %2202  ;;  %2206 = vtanh.f32 %v663_v56  ;;  %v779_v42 = vadd.f32 %v778_v13, %v2948_v49  ;;  %599 = vmatmul.f32.gmra.mxu2 %v2201_v39 }
 0x125   :  { %2208 = vtanh.f32 %v244_v34  ;;  %712 = vmatmul.f32.gmra.mxu3 %v2203_v41  ;;  %938 = vmatmul.f32.gmra.mxu1 %v2203_v41  ;;  %v1115_v14 = vadd.f32 %v1051_v36, %v1050_v19 }
 0x126   :  { %2210 = vtanh.f32 %v357_v35  ;;  %v892_v21 = vadd.f32 %v891_v37, %v779_v42  ;;  %825 = vmatmul.f32.gmra.mxu0 %v2201_v39  ;;  %v2205_v58 = vpop.eup %2204 }
 0x127   :  { %v552_v46 = vpop.f32.mrf.mxu2  ;;  %1116 = vadd.xlane.f32.xlu0 %v1115_v14  ;;  %v1053_v9 = vmul.f32 %v2205_v58, %v2968_v48  ;;  %v253_v14 = vadd.f32 %v2890_v8, %v2837_v24 }
 0x128   :  { %v553_v0 = vadd.f32 %v552_v46, %v2955_v29  ;;  %v665_v50 = vpop.f32.mrf.mxu3  ;;  %2212 = vtanh.f32 %v892_v21  ;;  %v366_v46 = vadd.f32 %v2894_v43, %v2839_v30 }
 0x12a   :  { %v2207_v53 = vpop.eup %2206  ;;  %v666_v60 = vadd.f32 %v665_v50, %v553_v0  ;;  %v894_v61 = vpop.f32.mrf.mxu1 }
 0x12b   :  { %v2209_v63 = vpop.eup %2208  ;;  %v781_v3 = vpop.f32.mrf.mxu0  ;;  %v1052_v4 = vmul.f32 %v2207_v53, %v2966_v47 }
 0x12c   :  { %v2211_v15 = vpop.eup %2210  ;;  %2214 = vtanh.f32 %v666_v60  ;;  %v782_v17 = vadd.f32 %v781_v3, %v2948_v49  ;;  %602 = vmatmul.f32.gmra.mxu2 %v2209_v63 }
 0x12d   :  { %2216 = vtanh.f32 %v247_v6  ;;  %715 = vmatmul.f32.gmra.mxu3 %v2211_v15  ;;  %941 = vmatmul.f32.gmra.mxu1 %v2211_v15  ;;  %v1118_v23 = vadd.f32 %v1053_v9, %v1052_v4  ;;  %v256_v15 = vadd.f32 %v2896_v45, %v2837_v24 }
 0x12e   :  { %2218 = vtanh.f32 %v360_v57  ;;  %v895_v31 = vadd.f32 %v894_v61, %v782_v17  ;;  %828 = vmatmul.f32.gmra.mxu0 %v2209_v63  ;;  %v2213_v20 = vpop.eup %2212 }
 0x12f   :  { %v555_v18 = vpop.f32.mrf.mxu2  ;;  %1119 = vadd.xlane.f32.xlu1 %v1118_v23  ;;  %v1055_v37 = vmul.f32 %v2213_v20, %v2968_v48  ;;  %v369_v23 = vadd.f32 %v2900_v52, %v2839_v30 }
 0x130   :  { %v556_v2 = vadd.f32 %v555_v18, %v2955_v29  ;;  %v668_v11 = vpop.f32.mrf.mxu3  ;;  %2220 = vtanh.f32 %v895_v31 }
 0x132   :  { %v2215_v25 = vpop.eup %2214  ;;  %v669_v32 = vadd.f32 %v668_v11, %v556_v2  ;;  %v897_v34 = vpop.f32.mrf.mxu1 }
 0x133   :  { %v2217_v51 = vpop.eup %2216  ;;  %v784_v35 = vpop.f32.mrf.mxu0  ;;  %v1054_v56 = vmul.f32 %v2215_v25, %v2966_v47 }
 0x134   :  { %v2219_v39 = vpop.eup %2218  ;;  %2222 = vtanh.f32 %v669_v32  ;;  %v785_v13 = vadd.f32 %v784_v35, %v2948_v49  ;;  %605 = vmatmul.f32.gmra.mxu2 %v2217_v51 }
 0x135   :  { %2224 = vtanh.f32 %v250_v22  ;;  %718 = vmatmul.f32.gmra.mxu3 %v2219_v39  ;;  %944 = vmatmul.f32.gmra.mxu1 %v2219_v39  ;;  %v1121_v33 = vadd.f32 %v1055_v37, %v1054_v56  ;;  %v259_v56 = vadd.f32 %v2902_v54, %v2837_v24  ;;  %v372_v39 = vadd.f32 %v2906_v62, %v2839_v30 }
 0x136   :  { %2226 = vtanh.f32 %v363_v27  ;;  %v898_v40 = vadd.f32 %v897_v34, %v785_v13  ;;  %831 = vmatmul.f32.gmra.mxu0 %v2217_v51  ;;  %v2221_v36 = vpop.eup %2220 }
 0x137   :  { %v558_v19 = vpop.f32.mrf.mxu2  ;;  %1122 = vadd.xlane.f32.xlu1 %v1121_v33  ;;  %v1057_v57 = vmul.f32 %v2221_v36, %v2968_v48 }
 0x138   :  { %v559_v41 = vadd.f32 %v558_v19, %v2955_v29  ;;  %v671_v42 = vpop.f32.mrf.mxu3  ;;  %2228 = vtanh.f32 %v898_v40 }
 0x13a   :  { %v2223_v21 = vpop.eup %2222  ;;  %v672_v58 = vadd.f32 %v671_v42, %v559_v41  ;;  %v900_v0 = vpop.f32.mrf.mxu1 }
 0x13b   :  { %v2225_v50 = vpop.eup %2224  ;;  %v787_v6 = vpop.f32.mrf.mxu0  ;;  %v1056_v53 = vmul.f32 %v2223_v21, %v2966_v47 }
 0x13c   :  { %v2227_v60 = vpop.eup %2226  ;;  %2230 = vtanh.f32 %v672_v58  ;;  %v788_v61 = vadd.f32 %v787_v6, %v2948_v49  ;;  %608 = vmatmul.f32.gmra.mxu2 %v2225_v50 }
 0x13d   :  { %2232 = vtanh.f32 %v253_v14  ;;  %721 = vmatmul.f32.gmra.mxu3 %v2227_v60  ;;  %947 = vmatmul.f32.gmra.mxu1 %v2227_v60  ;;  %v1124_v8 = vadd.f32 %v1057_v57, %v1056_v53  ;;  %v375_v53 = vadd.f32 %v2912_v12, %v2839_v30 }
 0x13e   :  { %2234 = vtanh.f32 %v366_v46  ;;  %v901_v43 = vadd.f32 %v900_v0, %v788_v61  ;;  %834 = vmatmul.f32.gmra.mxu0 %v2225_v50  ;;  %v2229_v3 = vpop.eup %2228  ;;  %v262_v50 = vadd.f32 %v2908_v1, %v2837_v24 }
 0x13f   :  { %v561_v63 = vpop.f32.mrf.mxu2  ;;  %1125 = vadd.xlane.f32.xlu2 %v1124_v8  ;;  %v1059_v22 = vmul.f32 %v2229_v3, %v2968_v48 }
 0x140   :  { %v562_v4 = vadd.f32 %v561_v63, %v2955_v29  ;;  %v674_v9 = vpop.f32.mrf.mxu3  ;;  %2236 = vtanh.f32 %v901_v43 }
 0x142   :  { %v2231_v17 = vpop.eup %2230  ;;  %v675_v31 = vadd.f32 %v674_v9, %v562_v4  ;;  %v903_v18 = vpop.f32.mrf.mxu1 }
 0x143   :  { %v2233_v20 = vpop.eup %2232  ;;  %v790_v2 = vpop.f32.mrf.mxu0  ;;  %v1058_v11 = vmul.f32 %v2231_v17, %v2966_v47 }
 0x144   :  { %v2235_v25 = vpop.eup %2234  ;;  %2238 = vtanh.f32 %v675_v31  ;;  %v791_v27 = vadd.f32 %v790_v2, %v2948_v49  ;;  %611 = vmatmul.f32.gmra.mxu2 %v2233_v20  ;;  %v265_v31 = vadd.f32 %v2914_v16, %v2837_v24 }
 0x145   :  { %2240 = vtanh.f32 %v256_v15  ;;  %724 = vmatmul.f32.gmra.mxu3 %v2235_v25  ;;  %950 = vmatmul.f32.gmra.mxu1 %v2235_v25  ;;  %v1127_v45 = vadd.f32 %v1059_v22, %v1058_v11 }
 0x146   :  { %2242 = vtanh.f32 %v369_v23  ;;  %v904_v52 = vadd.f32 %v903_v18, %v791_v27  ;;  %837 = vmatmul.f32.gmra.mxu0 %v2233_v20  ;;  %v2237_v34 = vpop.eup %2236  ;;  %v378_v20 = vadd.f32 %v2918_v26, %v2839_v30 }
 0x147   :  { %v564_v32 = vpop.f32.mrf.mxu2  ;;  %1128 = vadd.xlane.f32.xlu2 %v1127_v45  ;;  %v1061_v41 = vmul.f32 %v2237_v34, %v2968_v48 }
 0x148   :  { %v565_v51 = vadd.f32 %v564_v32, %v2955_v29  ;;  %v677_v35 = vpop.f32.mrf.mxu3  ;;  %2244 = vtanh.f32 %v904_v52 }
 0x14a   :  { %v2239_v37 = vpop.eup %2238  ;;  %v678_v13 = vadd.f32 %v677_v35, %v565_v51  ;;  %v906_v33 = vpop.f32.mrf.mxu1 }
 0x14b   :  { %v2241_v40 = vpop.eup %2240  ;;  %v793_v19 = vpop.f32.mrf.mxu0  ;;  %v1060_v36 = vmul.f32 %v2239_v37, %v2966_v47  ;;  %v268_v37 = vadd.f32 %v2920_v28, %v2837_v24 }
 0x14c   :  { %v2243_v42 = vpop.eup %2242  ;;  %2246 = vtanh.f32 %v678_v13  ;;  %v794_v14 = vadd.f32 %v793_v19, %v2948_v49  ;;  %614 = vmatmul.f32.gmra.mxu2 %v2241_v40  ;;  %v381_v13 = vadd.f32 %v2924_v38, %v2839_v30 }
 0x14d   :  { %2248 = vtanh.f32 %v259_v56  ;;  %727 = vmatmul.f32.gmra.mxu3 %v2243_v42  ;;  %953 = vmatmul.f32.gmra.mxu1 %v2243_v42  ;;  %v1130_v54 = vadd.f32 %v1061_v41, %v1060_v36 }
 0x14e   :  { %2250 = vtanh.f32 %v372_v39  ;;  %v907_v62 = vadd.f32 %v906_v33, %v794_v14  ;;  %840 = vmatmul.f32.gmra.mxu0 %v2241_v40  ;;  %v2245_v46 = vpop.eup %2244 }
 0x14f   :  { %v567_v21 = vpop.f32.mrf.mxu2  ;;  %1131 = vadd.xlane.f32.xlu0 %v1130_v54  ;;  %v1063_v63 = vmul.f32 %v2245_v46, %v2968_v48 }
 0x150   :  { %v568_v58 = vadd.f32 %v567_v21, %v2955_v29  ;;  %v680_v0 = vpop.f32.mrf.mxu3  ;;  %2252 = vtanh.f32 %v907_v62 }
 0x152   :  { %v2247_v6 = vpop.eup %2246  ;;  %v681_v57 = vadd.f32 %v680_v0, %v568_v58  ;;  %v909_v60 = vpop.f32.mrf.mxu1  ;;  %v271_v0 = vadd.f32 %v2926_v5, %v2837_v24 }
 0x153   :  { %v2249_v61 = vpop.eup %2248  ;;  %v796_v8 = vpop.f32.mrf.mxu0  ;;  %v1062_v43 = vmul.f32 %v2247_v6, %v2966_v47  ;;  %v384_v6 = vadd.f32 %v2930_v44, %v2839_v30 }
 0x154   :  { %v2251_v3 = vpop.eup %2250  ;;  %2254 = vtanh.f32 %v681_v57  ;;  %v797_v4 = vadd.f32 %v796_v8, %v2948_v49  ;;  %617 = vmatmul.f32.gmra.mxu2 %v2249_v61 }
 0x155   :  { %2256 = vtanh.f32 %v262_v50  ;;  %730 = vmatmul.f32.gmra.mxu3 %v2251_v3  ;;  %956 = vmatmul.f32.gmra.mxu1 %v2251_v3  ;;  %v1133_v1 = vadd.f32 %v1063_v63, %v1062_v43 }
 0x156   :  { %2258 = vtanh.f32 %v375_v53  ;;  %v910_v12 = vadd.f32 %v909_v60, %v797_v4  ;;  %843 = vmatmul.f32.gmra.mxu0 %v2249_v61  ;;  %v2253_v15 = vpop.eup %2252 }
 0x157   :  { %v570_v9 = vpop.f32.mrf.mxu2  ;;  %1134 = vadd.xlane.f32.xlu1 %v1133_v1  ;;  %v1065_v45 = vmul.f32 %v2253_v15, %v2968_v48  ;;  %v274_v15 = vadd.f32 %v2934_v55, %v2837_v24 }
 0x158   :  { %v571_v17 = vadd.f32 %v570_v9, %v2955_v29  ;;  %v683_v23 = vpop.f32.mrf.mxu3  ;;  %2260 = vtanh.f32 %v910_v12 }
 0x15a   :  { %v2255_v18 = vpop.eup %2254  ;;  %v684_v2 = vadd.f32 %v683_v23, %v571_v17  ;;  %v912_v11 = vpop.f32.mrf.mxu1  ;;  %v387_v23 = vadd.f32 %v2936_v59, %v2839_v30 }
 0x15b   :  { %v2257_v22 = vpop.eup %2256  ;;  %v799_v25 = vpop.f32.mrf.mxu0  ;;  %v1064_v27 = vmul.f32 %v2255_v18, %v2966_v47 }
 0x15c   :  { %v2259_v52 = vpop.eup %2258  ;;  %2262 = vtanh.f32 %v684_v2  ;;  %v800_v32 = vadd.f32 %v799_v25, %v2948_v49  ;;  %620 = vmatmul.f32.gmra.mxu2 %v2257_v22 }
 0x15d   :  { %2264 = vtanh.f32 %v265_v31  ;;  %733 = vmatmul.f32.gmra.mxu3 %v2259_v52  ;;  %959 = vmatmul.f32.gmra.mxu1 %v2259_v52  ;;  %v1136_v16 = vadd.f32 %v1065_v45, %v1064_v27 }
 0x15e   :  { %2266 = vtanh.f32 %v378_v20  ;;  %v913_v26 = vadd.f32 %v912_v11, %v800_v32  ;;  %846 = vmatmul.f32.gmra.mxu0 %v2257_v22  ;;  %v2261_v51 = vpop.eup %2260 }
 0x15f   :  { %v573_v34 = vpop.f32.mrf.mxu2  ;;  %1137 = vadd.xlane.f32.xlu2 %v1136_v16  ;;  %v1067_v42 = vmul.f32 %v2261_v51, %v2968_v48  ;;  %v390_v51 = vadd.f32 %v2946_v10, %v2839_v30 }
 0x160   :  { %v574_v35 = vadd.f32 %v573_v34, %v2955_v29  ;;  %v686_v56 = vpop.f32.mrf.mxu3  ;;  %2268 = vtanh.f32 %v913_v26  ;;  %v277_v26 = vadd.f32 %v2941_v7, %v2837_v24 }
 0x162   :  { %v2263_v39 = vpop.eup %2262  ;;  %v687_v33 = vadd.f32 %v686_v56, %v574_v35  ;;  %v915_v40 = vpop.f32.mrf.mxu1 }
 0x163   :  { %v2265_v19 = vpop.eup %2264  ;;  %v802_v36 = vpop.f32.mrf.mxu0  ;;  %v1066_v41 = vmul.f32 %v2263_v39, %v2966_v47 }
 0x164   :  { %v2267_v14 = vpop.eup %2266  ;;  %2270 = vtanh.f32 %v687_v33  ;;  %v803_v54 = vadd.f32 %v802_v36, %v2948_v49  ;;  %623 = vmatmul.f32.gmra.mxu2 %v2265_v19 }
 0x165   :  { %2272 = vtanh.f32 %v268_v37  ;;  %736 = vmatmul.f32.gmra.mxu3 %v2267_v14  ;;  %962 = vmatmul.f32.gmra.mxu1 %v2267_v14  ;;  %v1139_v28 = vadd.f32 %v1067_v42, %v1066_v41 }
 0x166   :  { %2274 = vtanh.f32 %v381_v13  ;;  %v916_v38 = vadd.f32 %v915_v40, %v803_v54  ;;  %849 = vmatmul.f32.gmra.mxu0 %v2265_v19  ;;  %v2269_v21 = vpop.eup %2268 }
 0x167   :  { %v576_v62 = vpop.f32.mrf.mxu2  ;;  %1140 = vadd.xlane.f32.xlu0 %v1139_v28  ;;  %v1069_v43 = vmul.f32 %v2269_v21, %v2968_v48 }
 0x168   :  { %v577_v46 = vadd.f32 %v576_v62, %v2955_v29  ;;  %v689_v58 = vpop.f32.mrf.mxu3  ;;  %2276 = vtanh.f32 %v916_v38 }
 0x16a   :  { %v2271_v50 = vpop.eup %2270  ;;  %v690_v53 = vadd.f32 %v689_v58, %v577_v46  ;;  %v918_v57 = vpop.f32.mrf.mxu1 }
 0x16b   :  { %v2273_v60 = vpop.eup %2272  ;;  %v805_v61 = vpop.f32.mrf.mxu0  ;;  %v1068_v8 = vmul.f32 %v2271_v50, %v2966_v47 }
 0x16c   :  { %v2275_v63 = vpop.eup %2274  ;;  %2278 = vtanh.f32 %v690_v53  ;;  %v806_v3 = vadd.f32 %v805_v61, %v2948_v49  ;;  %626 = vmatmul.f32.gmra.mxu2 %v2273_v60 }
 0x16d   :  { %2280 = vtanh.f32 %v271_v0  ;;  %739 = vmatmul.f32.gmra.mxu3 %v2275_v63  ;;  %965 = vmatmul.f32.gmra.mxu1 %v2275_v63  ;;  %v1142_v5 = vadd.f32 %v1069_v43, %v1068_v8 }
 0x16e   :  { %2282 = vtanh.f32 %v384_v6  ;;  %v919_v44 = vadd.f32 %v918_v57, %v806_v3  ;;  %852 = vmatmul.f32.gmra.mxu0 %v2273_v60  ;;  %v2277_v1 = vpop.eup %2276 }
 0x16f   :  { %v579_v4 = vpop.f32.mrf.mxu2  ;;  %1143 = vadd.xlane.f32.xlu1 %v1142_v5  ;;  %v1071_v22 = vmul.f32 %v2277_v1, %v2968_v48 }
 0x170   :  { %v580_v12 = vadd.f32 %v579_v4, %v2955_v29  ;;  %v692_v9 = vpop.f32.mrf.mxu3  ;;  %2284 = vtanh.f32 %v919_v44 }
 0x172   :  { %v2279_v17 = vpop.eup %2278  ;;  %v693_v31 = vadd.f32 %v692_v9, %v580_v12  ;;  %v921_v18 = vpop.f32.mrf.mxu1 }
 0x173   :  { %v2281_v20 = vpop.eup %2280  ;;  %v808_v2 = vpop.f32.mrf.mxu0  ;;  %v1070_v11 = vmul.f32 %v2279_v17, %v2966_v47 }
 0x174   :  { %v2283_v25 = vpop.eup %2282  ;;  %2286 = vtanh.f32 %v693_v31  ;;  %v809_v27 = vadd.f32 %v808_v2, %v2948_v49  ;;  %629 = vmatmul.f32.gmra.mxu2 %v2281_v20 }
 0x175   :  { %2288 = vtanh.f32 %v274_v15  ;;  %742 = vmatmul.f32.gmra.mxu3 %v2283_v25  ;;  %968 = vmatmul.f32.gmra.mxu1 %v2283_v25  ;;  %v1145_v55 = vadd.f32 %v1071_v22, %v1070_v11  ;;  %v3086_v15 = vstv %s3460_s6 }
 0x176   :  { %2290 = vtanh.f32 %v387_v23  ;;  %v922_v59 = vadd.f32 %v921_v18, %v809_v27  ;;  %855 = vmatmul.f32.gmra.mxu0 %v2281_v20  ;;  %v2285_v52 = vpop.eup %2284 }
 0x177   :  { %v582_v45 = vpop.f32.mrf.mxu2  ;;  %1146 = vadd.xlane.f32.xlu2 %v1145_v55  ;;  %v1073_v33 = vmul.f32 %v2285_v52, %v2968_v48 }
 0x178   :  { %v583_v32 = vadd.f32 %v582_v45, %v2955_v29  ;;  %v695_v16 = vpop.f32.mrf.mxu3  ;;  %2292 = vtanh.f32 %v922_v59 }
 0x17a   :  { %v2287_v34 = vpop.eup %2286  ;;  %v696_v35 = vadd.f32 %v695_v16, %v583_v32  ;;  %v924_v56 = vpop.f32.mrf.mxu1 }
 0x17b   :  { %v2289_v37 = vpop.eup %2288  ;;  %v811_v39 = vpop.f32.mrf.mxu0  ;;  %v1072_v13 = vmul.f32 %v2287_v34, %v2966_v47 }
 0x17c   :  { %v2291_v40 = vpop.eup %2290  ;;  %2294 = vtanh.f32 %v696_v35  ;;  %v812_v19 = vadd.f32 %v811_v39, %v2948_v49  ;;  %632 = vmatmul.f32.gmra.mxu2 %v2289_v37 }
 0x17d   :  { %2296 = vtanh.f32 %v277_v26  ;;  %745 = vmatmul.f32.gmra.mxu3 %v2291_v40  ;;  %971 = vmatmul.f32.gmra.mxu1 %v2291_v40  ;;  %v1148_v24 = vadd.f32 %v1073_v33, %v1072_v13  ;;  %v2372_v33 = vmov 0  }
 0x17e   :  { %2298 = vtanh.f32 %v390_v51  ;;  %v925_v30 = vadd.f32 %v924_v56, %v812_v19  ;;  %858 = vmatmul.f32.gmra.mxu0 %v2289_v37  ;;  %v2293_v10 = vpop.eup %2292  ;;  %2113 = vset.pattern.permute.xlu2 %v2372_v33 }
 0x17f   :  { %v585_v7 = vpop.f32.mrf.mxu2  ;;  %1149 = vadd.xlane.f32.xlu0 %v1148_v24  ;;  %v1075_v21 = vmul.f32 %v2293_v10, %v2968_v48  ;;  %2115 = vset.pattern.permute.xlu1 %v2372_v33 }
 0x180   :  { %v586_v36 = vadd.f32 %v585_v7, %v2955_v29  ;;  %v698_v41 = vpop.f32.mrf.mxu3  ;;  %2300 = vtanh.f32 %v925_v30  ;;  %2114 = vset.pattern.permute.xlu0 %v2372_v33 }
 0x182   :  { %v2295_v42 = vpop.eup %2294  ;;  %v699_v14 = vadd.f32 %v698_v41, %v586_v36  ;;  %v927_v54 = vpop.f32.mrf.mxu1 }
 0x183   :  { %v2297_v28 = vpop.eup %2296  ;;  %v814_v38 = vpop.f32.mrf.mxu0  ;;  %v1074_v62 = vmul.f32 %v2295_v42, %v2966_v47 }
 0x184   :  { %v2299_v46 = vpop.eup %2298  ;;  %2302 = vtanh.f32 %v699_v14  ;;  %v815_v58 = vadd.f32 %v814_v38, %v2948_v49  ;;  %635 = vmatmul.f32.gmra.mxu2 %v2297_v28 }
 0x185   :  { %748 = vmatmul.f32.gmra.mxu3 %v2299_v46  ;;  %974 = vmatmul.f32.gmra.mxu1 %v2299_v46  ;;  %v1151_v0 = vadd.f32 %v1075_v21, %v1074_v62 }
 0x186   :  { %v928_v50 = vadd.f32 %v927_v54, %v815_v58  ;;  %v2301_v53 = vpop.eup %2300 }
 0x187   :  { %v588_v6 = vpop.f32.mrf.mxu2  ;;  %1152 = vadd.xlane.f32.xlu1 %v1151_v0  ;;  %v1077_v5 = vmul.f32 %v2301_v53, %v2968_v48 }
 0x188   :  { %v589_v57 = vadd.f32 %v588_v6, %v2955_v29  ;;  %v701_v60 = vpop.f32.mrf.mxu3  ;;  %2304 = vtanh.f32 %v928_v50 }
 0x18a   :  { %v2303_v61 = vpop.eup %2302  ;;  %v702_v8 = vadd.f32 %v701_v60, %v589_v57  ;;  %v930_v43 = vpop.f32.mrf.mxu1 }
 0x18b   :  { %v817_v63 = vpop.f32.mrf.mxu0  ;;  %v1076_v3 = vmul.f32 %v2303_v61, %v2966_v47 }
 0x18c   :  { %2306 = vtanh.f32 %v702_v8  ;;  %v818_v44 = vadd.f32 %v817_v63, %v2948_v49  ;;  %861 = vmatmul.f32.vlgmr.msra.gmra.mxu2 %v2297_v28 }
 0x18d   :  { %v1154_v4 = vadd.f32 %v1077_v5, %v1076_v3 }
 0x18e   :  { %v931_v1 = vadd.f32 %v930_v43, %v818_v44  ;;  %v2305_v17 = vpop.eup %2304 }
 0x18f   :  { %v591_v12 = vpop.f32.mrf.mxu2  ;;  %1155 = vadd.xlane.f32.xlu2 %v1154_v4  ;;  %v1079_v45 = vmul.f32 %v2305_v17, %v2968_v48 }
 0x190   :  { %v592_v9 = vadd.f32 %v591_v12, %v2955_v29  ;;  %v704_v23 = vpop.f32.mrf.mxu3  ;;  %2308 = vtanh.f32 %v931_v1 }
 0x192   :  { %v2307_v31 = vpop.eup %2306  ;;  %v705_v18 = vadd.f32 %v704_v23, %v592_v9  ;;  %v3088_v20 = vpop.f32.mrf.mxu1 }
 0x193   :  { %v1114_v2 = vpop.xlane.xlu0 %1113  ;;  %v3090_v11 = vpop.f32.mrf.mxu0  ;;  %v1078_v25 = vmul.f32 %v2307_v31, %v2966_v47 }
 0x194   :  { %v1210_v22 = vadd.f32 %v3086_v15, %v1114_v2  ;;  %2310 = vtanh.f32 %v705_v18 }
 0x195   :  { %v1157_v16 = vadd.f32 %v1079_v45, %v1078_v25 }
 0x196   :  { %v1274_v27 = vperm.slane %v1210_v22, 0  ;;  %v1275_v55 = vperm.slane %v1210_v22, 1  ;;  %v1276_v59 = vperm.slane %v1210_v22, 2  ;;  %v1277_v52 = vperm.slane %v1210_v22, 3  ;;  %v2309_v34 = vpop.eup %2308 }
 0x197   :  { %v1278_v32 = vperm.slane %v1210_v22, 4  ;;  %v1279_v26 = vperm.slane %v1210_v22, 5  ;;  %v1280_v51 = vperm.slane %v1210_v22, 6  ;;  %1158 = vadd.xlane.f32.xlu0 %v1157_v16  ;;  %v1281_v56 = vperm.slane %v1210_v22, 7  ;;  %v594_v40 = vpop.f32.mrf.mxu2 }
 0x198   :  { %1530 = vst [vmem:[#allocation1] ss:$9 sm:$0xff] %v1274_v27  ;;  %v1081_v24 = vmul.f32 %v2309_v34, %v2968_v48  ;;  %v707_v30 = vpop.f32.mrf.mxu3  ;;  %v595_v23 = vadd.f32 %v594_v40, %v2955_v29  ;;  %v821_v22 = vadd.f32 %v3090_v11, %v2948_v49 }
 0x199   :  { %1532 = vst [vmem:[#allocation1 + $0x1] ss:$9 sm:$0xff] %v1275_v55 }
 0x19a   :  { %1534 = vst [vmem:[#allocation1 + $0x2] ss:$9 sm:$0xff] %v1276_v59  ;;  %v2311_v35 = vpop.eup %2310  ;;  %v3098_v19 = vpop.f32.mrf.mxu1  ;;  %v708_v55 = vadd.f32 %v707_v30, %v595_v23  ;;  %v934_v59 = vadd.f32 %v3088_v20, %v821_v22 }
 0x19b   :  { %1536 = vst [vmem:[#allocation1 + $0x3] ss:$9 sm:$0xff] %v1277_v52  ;;  %v3095_v37 = vpop.f32.mrf.mxu0  ;;  %v1117_v39 = vpop.xlane.xlu0 %1116  ;;  %v1080_v13 = vmul.f32 %v2311_v35, %v2966_v47 }
 0x19c   :  { %1538 = vst [vmem:[#allocation1 + $0x4] ss:$9 sm:$0xff] %v1278_v32  ;;  %v1211_v7 = vadd.f32 %v3086_v15, %v1117_v39  ;;  %2312 = vtanh.f32 %v708_v55 }
 0x19d   :  { %1540 = vst [vmem:[#allocation1 + $0x5] ss:$9 sm:$0xff] %v1279_v26  ;;  %v1160_v10 = vadd.f32 %v1081_v24, %v1080_v13  ;;  %2314 = vtanh.f32 %v934_v59 }
 0x19e   :  { %1542 = vst [vmem:[#allocation1 + $0x6] ss:$9 sm:$0xff] %v1280_v51  ;;  %v1282_v36 = vperm.slane %v1211_v7, 0  ;;  %v1283_v41 = vperm.slane %v1211_v7, 1  ;;  %v1284_v42 = vperm.slane %v1211_v7, 2  ;;  %v1285_v28 = vperm.slane %v1211_v7, 3 }
 0x19f   :  { %1544 = vst [vmem:[#allocation1 + $0x7] ss:$9 sm:$0xff] %v1281_v56  ;;  %1161 = vadd.xlane.f32.xlu1 %v1160_v10  ;;  %v1286_v38 = vperm.slane %v1211_v7, 4  ;;  %v3104_v62 = vpop.f32.mrf.mxu2  ;;  %v1287_v46 = vperm.slane %v1211_v7, 5  ;;  %v1288_v58 = vperm.slane %v1211_v7, 6  ;;  %v1289_v50 = vperm.slane %v1211_v7, 7 }
 0x1a0   :  { %v3108_v0 = vpop.f32.mrf.mxu3  ;;  %v598_v40 = vadd.f32 %v3104_v62, %v2955_v29  ;;  %v824_v7 = vadd.f32 %v3095_v37, %v2948_v49 }
 0x1a2   :  { %v3106_v21 = vpop.f32.mrf.mxu1  ;;  %v1120_v6 = vpop.xlane.xlu1 %1119 }
 0x1a3   :  { %v3102_v14 = vpop.f32.mrf.mxu0  ;;  %v1212_v53 = vadd.f32 %v3086_v15, %v1120_v6  ;;  %v2313_v13 = vpop.eup %2312 }
 0x1a4   :  { %v2315_v30 = vpop.eup %2314  ;;  %v1082_v10 = vmul.f32 %v2313_v13, %v2966_v47 }
 0x1a5   :  { %v1290_v8 = vperm.slane %v1212_v53, 0  ;;  %v1291_v43 = vperm.slane %v1212_v53, 1  ;;  %v1292_v3 = vperm.slane %v1212_v53, 2  ;;  %v1293_v44 = vperm.slane %v1212_v53, 3 }
 0x1a6   :  { %v1545_v54 = vld [vmem:[#allocation1] sm:$0xff]  ;;  %v1294_v4 = vperm.slane %v1212_v53, 4  ;;  %v1295_v1 = vperm.slane %v1212_v53, 5  ;;  %v1296_v12 = vperm.slane %v1212_v53, 6  ;;  %v1297_v9 = vperm.slane %v1212_v53, 7 }
 0x1a7   :  { %1546 = vst [vmem:[#allocation1] ss:$9 sm:$0xff] %v1282_v36  ;;  %1826 = vperm.xlu2 %2113, %v1545_v54   ;;  %v3113_v60 = vpop.f32.mrf.mxu2  ;;  %v1083_v54 = vmul.f32 %v2315_v30, %v2968_v48 }
 0x1a8   :  { %1547 = vst [vmem:[#allocation1 + $0x1] ss:$9 sm:$0xff] %v1283_v41  ;;  %v3117_v63 = vpop.f32.mrf.mxu3  ;;  %v711_v41 = vadd.f32 %v3108_v0, %v598_v40 }
 0x1a9   :  { %1548 = vst [vmem:[#allocation1 + $0x2] ss:$9 sm:$0xff] %v1284_v42 }
 0x1aa   :  { %1549 = vst [vmem:[#allocation1 + $0x3] ss:$9 sm:$0xff] %v1285_v28  ;;  %v3115_v61 = vpop.f32.mrf.mxu1  ;;  %v1123_v31 = vpop.xlane.xlu1 %1122  ;;  %2316 = vtanh.f32 %v711_v41 }
 0x1ab   :  { %1550 = vst [vmem:[#allocation1 + $0x4] ss:$9 sm:$0xff] %v1286_v38  ;;  %v3111_v57 = vpop.f32.mrf.mxu0  ;;  %v1213_v25 = vadd.f32 %v3086_v15, %v1123_v31  ;;  %v937_v38 = vadd.f32 %v3098_v19, %v824_v7 }
 0x1ac   :  { %1551 = vst [vmem:[#allocation1 + $0x5] ss:$9 sm:$0xff] %v1287_v46 }
 0x1ad   :  { %1552 = vst [vmem:[#allocation1 + $0x6] ss:$9 sm:$0xff] %v1288_v58  ;;  %v1298_v45 = vperm.slane %v1213_v25, 0  ;;  %v1299_v52 = vperm.slane %v1213_v25, 1  ;;  %v1300_v32 = vperm.slane %v1213_v25, 2  ;;  %v1301_v34 = vperm.slane %v1213_v25, 3 }
 0x1ae   :  { %1553 = vst [vmem:[#allocation1 + $0x7] ss:$9 sm:$0xff] %v1289_v50  ;;  %v1302_v51 = vperm.slane %v1213_v25, 4  ;;  %v1303_v56 = vperm.slane %v1213_v25, 5  ;;  %v1304_v39 = vperm.slane %v1213_v25, 6  ;;  %v1305_v33 = vperm.slane %v1213_v25, 7 }
 0x1af   :  { %v3122_v18 = vpop.f32.mrf.mxu2  ;;  %v1163_v58 = vadd.f32 %v1083_v54, %v1082_v10  ;;  %2318 = vtanh.f32 %v937_v38  ;;  %v827_v25 = vadd.f32 %v3102_v14, %v2948_v49 }
 0x1b0   :  { %v3129_v27 = vpop.f32.mrf.mxu3 }
 0x1b1   :  { %v940_v14 = vadd.f32 %v3106_v21, %v827_v25 }
 0x1b2   :  { %v3124_v2 = vpop.f32.mrf.mxu1  ;;  %v1126_v24 = vpop.xlane.xlu2 %1125 }
 0x1b3   :  { %v3119_v17 = vpop.f32.mrf.mxu0  ;;  %v1214_v36 = vadd.f32 %v3086_v15, %v1126_v24 }
 0x1b5   :  { %v1554_v5 = vld [vmem:[#allocation1] sm:$0xff]  ;;  %v1306_v37 = vperm.slane %v1214_v36, 0  ;;  %v1307_v6 = vperm.slane %v1214_v36, 1  ;;  %v1308_v0 = vperm.slane %v1214_v36, 2  ;;  %v1312_v19 = vperm.slane %v1214_v36, 6 }
 0x1b6   :  { %1555 = vst [vmem:[#allocation1] ss:$9 sm:$0xff] %v1290_v8  ;;  %1829 = vperm.xlu0 %2114, %v1554_v5   ;;  %v1311_v5 = vperm.slane %v1214_v36, 5 }
 0x1b7   :  { %1556 = vst [vmem:[#allocation1 + $0x1] ss:$9 sm:$0xff] %v1291_v43  ;;  %v606_v11 = vpop.f32.mrf.mxu2  ;;  %v1309_v43 = vperm.slane %v1214_v36, 3 }
 0x1b8   :  { %1557 = vst [vmem:[#allocation1 + $0x2] ss:$9 sm:$0xff] %v1292_v3  ;;  %v719_v20 = vpop.f32.mrf.mxu3  ;;  %v1310_v3 = vperm.slane %v1214_v36, 4  ;;  %v607_v31 = vadd.f32 %v606_v11, %v2955_v29 }
 0x1b9   :  { %1558 = vst [vmem:[#allocation1 + $0x3] ss:$9 sm:$0xff] %v1293_v44  ;;  %v2317_v44 = vpop.eup %2316 }
 0x1ba   :  { %1559 = vst [vmem:[#allocation1 + $0x4] ss:$9 sm:$0xff] %v1294_v4  ;;  %v3134_v35 = vpop.f32.mrf.mxu1  ;;  %v601_v4 = vadd.f32 %v3113_v60, %v2955_v29  ;;  %v2319_v23 = vpop.eup %2318  ;;  %v1084_v60 = vmul.f32 %v2317_v44, %v2966_v47 }
 0x1bb   :  { %1560 = vst [vmem:[#allocation1 + $0x5] ss:$9 sm:$0xff] %v1295_v1  ;;  %v3132_v16 = vpop.f32.mrf.mxu0  ;;  %v1313_v1 = vperm.slane %v1214_v36, 7 }
 0x1bc   :  { %1561 = vst [vmem:[#allocation1 + $0x6] ss:$9 sm:$0xff] %v1296_v12  ;;  %v833_v12 = vadd.f32 %v3119_v17, %v2948_v49  ;;  %v714_v59 = vadd.f32 %v3117_v63, %v601_v4 }
 0x1bd   :  { %1562 = vst [vmem:[#allocation1 + $0x7] ss:$9 sm:$0xff] %v1297_v9  ;;  %v1129_v9 = vpop.xlane.xlu2 %1128 }
 0x1be   :  { %v1215_v17 = vadd.f32 %v3086_v15, %v1129_v9  ;;  %2320 = vtanh.f32 %v714_v59 }
 0x1bf   :  { %v3146_v62 = vpop.f32.mrf.mxu2 }
 0x1c0   :  { %v3150_v53 = vpop.f32.mrf.mxu3  ;;  %v1314_v11 = vperm.slane %v1215_v17, 0  ;;  %v1316_v63 = vperm.slane %v1215_v17, 2  ;;  %v1317_v13 = vperm.slane %v1215_v17, 3  ;;  %v1321_v24 = vperm.slane %v1215_v17, 7 }
 0x1c2   :  { %v951_v46 = vpop.f32.mrf.mxu1  ;;  %v1132_v10 = vpop.xlane.xlu0 %1131 }
 0x1c3   :  { %v838_v42 = vpop.f32.mrf.mxu0  ;;  %v1216_v54 = vadd.f32 %v3086_v15, %v1132_v10 }
 0x1c4   :  { %v1563_v26 = vld [vmem:[#allocation1] sm:$0xff]  ;;  %v839_v28 = vadd.f32 %v838_v42, %v2948_v49  ;;  %v2321_v40 = vpop.eup %2320 }
 0x1c5   :  { %1564 = vst [vmem:[#allocation1] ss:$9 sm:$0xff] %v1298_v45  ;;  %1832 = vperm.xlu1 %2115, %v1563_v26   ;;  %v1085_v26 = vmul.f32 %v2319_v23, %v2968_v48  ;;  %v1086_v42 = vmul.f32 %v2321_v40, %v2966_v47  ;;  %v1329_v23 = vperm.slane %v1216_v54, 7 }
 0x1c6   :  { %1565 = vst [vmem:[#allocation1 + $0x1] ss:$9 sm:$0xff] %v1299_v52  ;;  %v3148_v50 = vadd.f32 %v951_v46, %v839_v28  ;;  %v946_v52 = vadd.f32 %v3124_v2, %v833_v12  ;;  %v1318_v2 = vperm.slane %v1215_v17, 4  ;;  %v1328_v12 = vperm.slane %v1216_v54, 6 }
 0x1c7   :  { %1566 = vst [vmem:[#allocation1 + $0x2] ss:$9 sm:$0xff] %v1300_v32  ;;  %v612_v22 = vpop.f32.mrf.mxu2 }
 0x1c8   :  { %1567 = vst [vmem:[#allocation1 + $0x3] ss:$9 sm:$0xff] %v1301_v34  ;;  %v613_v55 = vadd.f32 %v612_v22, %v2955_v29  ;;  %v725_v45 = vpop.f32.mrf.mxu3  ;;  %v720_v34 = vadd.f32 %v719_v20, %v607_v31  ;;  %2322 = vtanh.f32 %v946_v52  ;;  %v1320_v20 = vperm.slane %v1215_v17, 6 }
 0x1c9   :  { %1568 = vst [vmem:[#allocation1 + $0x4] ss:$9 sm:$0xff] %v1302_v51  ;;  %v1166_v51 = vadd.f32 %v1085_v26, %v1084_v60 }
 0x1ca   :  { %1569 = vst [vmem:[#allocation1 + $0x5] ss:$9 sm:$0xff] %v1303_v56  ;;  %v3164_v32 = vadd.f32 %v725_v45, %v613_v55  ;;  %v1315_v56 = vperm.slane %v1215_v17, 1  ;;  %2324 = vtanh.f32 %v720_v34  ;;  %v954_v41 = vpop.f32.mrf.mxu1  ;;  %v1135_v31 = vpop.xlane.xlu1 %1134  ;;  %v830_v45 = vadd.f32 %v3111_v57, %v2948_v49 }
 0x1cb   :  { %1570 = vst [vmem:[#allocation1 + $0x6] ss:$9 sm:$0xff] %v1304_v39  ;;  %2326 = vtanh.f32 %v940_v14  ;;  %v841_v30 = vpop.f32.mrf.mxu0  ;;  %v1217_v55 = vadd.f32 %v3086_v15, %v1135_v31  ;;  %v604_v14 = vadd.f32 %v3122_v18, %v2955_v29 }
 0x1cc   :  { %1571 = vst [vmem:[#allocation1 + $0x7] ss:$9 sm:$0xff] %v1305_v33  ;;  %v1319_v33 = vperm.slane %v1215_v17, 5  ;;  %v842_v22 = vadd.f32 %v841_v30, %v2948_v49 }
 0x1cd   :  { %v1333_v57 = vperm.slane %v1217_v55, 3  ;;  %v717_v40 = vadd.f32 %v3129_v27, %v604_v14  ;;  %v1336_v18 = vperm.slane %v1217_v55, 6 }
 0x1ce   :  { %v2323_v21 = vpop.eup %2322  ;;  %v955_v59 = vadd.f32 %v954_v41, %v842_v22 }
 0x1cf   :  { %v1091_v38 = vmul.f32 %v2323_v21, %v2968_v48  ;;  %v615_v44 = vpop.f32.mrf.mxu2  ;;  %v1335_v21 = vperm.slane %v1217_v55, 5 }
 0x1d0   :  { %1164 = vadd.xlane.f32.xlu2 %v1163_v58  ;;  %v2325_v7 = vpop.eup %2324  ;;  %v728_v9 = vpop.f32.mrf.mxu3  ;;  %v616_v25 = vadd.f32 %v615_v44, %v2955_v29  ;;  %2328 = vtanh.f32 %v955_v59 }
 0x1d1   :  { %v2327_v36 = vpop.eup %2326  ;;  %v1090_v28 = vmul.f32 %v2325_v7, %v2966_v47 }
 0x1d2   :  { %v1087_v46 = vmul.f32 %v2327_v36, %v2968_v48  ;;  %v3177_v4 = vpop.f32.mrf.mxu1  ;;  %v729_v52 = vadd.f32 %v728_v9, %v616_v25  ;;  %v1138_v7 = vpop.xlane.xlu2 %1137 }
 0x1d3   :  { %v1572_v8 = vld [vmem:[#allocation1] sm:$0xff]  ;;  %v1175_v58 = vadd.f32 %v1091_v38, %v1090_v28  ;;  %v1218_v27 = vadd.f32 %v3086_v15, %v1138_v7 }
 0x1d4   :  { %1573 = vst [vmem:[#allocation1] ss:$9 sm:$0xff] %v1306_v37  ;;  %v1169_v37 = vadd.f32 %v1087_v46, %v1086_v42  ;;  %2330 = vtanh.f32 %v729_v52 }
 0x1d5   :  { %1574 = vst [vmem:[#allocation1 + $0x1] ss:$9 sm:$0xff] %v1307_v6  ;;  %v1322_v6 = vperm.slane %v1216_v54, 0  ;;  %v1342_v44 = vperm.slane %v1218_v27, 4  ;;  %v1344_v9 = vperm.slane %v1218_v27, 6 }
 0x1d6   :  { %1575 = vst [vmem:[#allocation1 + $0x2] ss:$9 sm:$0xff] %v1308_v0  ;;  %v1323_v0 = vperm.slane %v1216_v54, 1  ;;  %v2329_v30 = vpop.eup %2328 }
 0x1d7   :  { %1576 = vst [vmem:[#allocation1 + $0x3] ss:$9 sm:$0xff] %v1309_v43  ;;  %v1324_v43 = vperm.slane %v1216_v54, 2  ;;  %v3185_v26 = vpop.f32.mrf.mxu2  ;;  %v1097_v28 = vmul.f32 %v2329_v30, %v2968_v48 }
 0x1d8   :  { %1577 = vst [vmem:[#allocation1 + $0x4] ss:$9 sm:$0xff] %v1310_v3  ;;  %v3175_v3 = vpop.f32.mrf.mxu0 }
 0x1d9   :  { %1578 = vst [vmem:[#allocation1 + $0x5] ss:$9 sm:$0xff] %v1311_v5 }
 0x1da   :  { %1579 = vst [vmem:[#allocation1 + $0x6] ss:$9 sm:$0xff] %v1312_v19  ;;  %v1326_v19 = vperm.slane %v1216_v54, 4  ;;  %v960_v34 = vpop.f32.mrf.mxu1  ;;  %v1141_v22 = vpop.xlane.xlu0 %1140 }
 0x1db   :  { %1580 = vst [vmem:[#allocation1 + $0x7] ss:$9 sm:$0xff] %v1313_v1  ;;  %v1327_v1 = vperm.slane %v1216_v54, 5 }
 0x1df   :  { %v621_v10 = vpop.f32.mrf.mxu2 }
 0x1e0   :  { %1167 = vadd.xlane.f32.xlu0 %v1166_v51  ;;  %v847_v60 = vpop.f32.mrf.mxu0  ;;  %v1330_v51 = vperm.slane %v1217_v55, 0  ;;  %v622_v36 = vadd.f32 %v621_v10, %v2955_v29 }
 0x1e1   :  { %v848_v17 = vadd.f32 %v847_v60, %v2948_v49  ;;  %v610_v60 = vadd.f32 %v3146_v62, %v2955_v29 }
 0x1e2   :  { %v3168_v39 = vld [vmem:[#allocation1] sm:$0xff]  ;;  %v3209_v25 = vpop.f32.mrf.mxu1 }
 0x1e3   :  { %1582 = vst [vmem:[#allocation1] ss:$9 sm:$0xff] %v1314_v11  ;;  %v3189_v11 = vadd.f32 %v960_v34, %v848_v17  ;;  %v723_v52 = vadd.f32 %v3150_v53, %v610_v60 }
 0x1e4   :  { %1583 = vst [vmem:[#allocation1 + $0x1] ss:$9 sm:$0xff] %v1315_v56  ;;  %v1331_v56 = vperm.slane %v1217_v55, 1 }
 0x1e5   :  { %1584 = vst [vmem:[#allocation1 + $0x2] ss:$9 sm:$0xff] %v1316_v63  ;;  %v3191_v63 = vpop.f32.mrf.mxu3 }
 0x1e6   :  { %1585 = vst [vmem:[#allocation1 + $0x3] ss:$9 sm:$0xff] %v1317_v13  ;;  %v1332_v13 = vperm.slane %v1217_v55, 2 }
 0x1e7   :  { %1586 = vst [vmem:[#allocation1 + $0x4] ss:$9 sm:$0xff] %v1318_v2  ;;  %v943_v2 = vadd.f32 %v3115_v61, %v830_v45  ;;  %v2331_v61 = vpop.eup %2330  ;;  %v836_v45 = vadd.f32 %v3132_v16, %v2948_v49 }
 0x1e8   :  { %1587 = vst [vmem:[#allocation1 + $0x5] ss:$9 sm:$0xff] %v1319_v33  ;;  %1835 = vperm.xlu2 %2113, %v1572_v8   ;;  %1176 = vadd.xlane.f32.xlu0 %v1175_v58  ;;  %v1325_v8 = vperm.slane %v1216_v54, 3  ;;  %v1096_v54 = vmul.f32 %v2331_v61, %v2966_v47  ;;  %v3207_v31 = vpop.f32.mrf.mxu0 }
 0x1e9   :  { %1588 = vst [vmem:[#allocation1 + $0x6] ss:$9 sm:$0xff] %v1320_v20  ;;  %v1334_v20 = vperm.slane %v1217_v55, 4  ;;  %2332 = vtanh.f32 %v943_v2  ;;  %v3219_v2 = vpop.f32.mrf.mxu2  ;;  %v949_v62 = vadd.f32 %v3134_v35, %v836_v45 }
 0x1ea   :  { %1589 = vst [vmem:[#allocation1 + $0x7] ss:$9 sm:$0xff] %v1321_v24  ;;  %v1337_v24 = vperm.slane %v1217_v55, 7  ;;  %2334 = vtanh.f32 %v717_v40  ;;  %v1184_v58 = vadd.f32 %v1097_v28, %v1096_v54  ;;  %v1219_v55 = vadd.f32 %v3086_v15, %v1141_v22 }
 0x1eb   :  { %2336 = vtanh.f32 %v723_v52 }
 0x1ec   :  { %v1346_v59 = vperm.slane %v1219_v55, 0  ;;  %v1347_v17 = vperm.slane %v1219_v55, 1  ;;  %v1348_v34 = vperm.slane %v1219_v55, 2  ;;  %v1351_v40 = vperm.slane %v1219_v55, 5 }
 0x1ed   :  { %v734_v41 = vpop.f32.mrf.mxu3  ;;  %2338 = vtanh.f32 %v3148_v50  ;;  %v1353_v53 = vperm.slane %v1219_v55, 7 }
 0x1ee   :  { %v3199_v42 = vadd.f32 %v734_v41, %v622_v36  ;;  %2340 = vtanh.f32 %v3164_v32 }
 0x1ef   :  { %1170 = vadd.xlane.f32.xlu1 %v1169_v37  ;;  %v2333_v38 = vpop.eup %2332  ;;  %v1338_v37 = vperm.slane %v1218_v27, 0  ;;  %2342 = vtanh.f32 %v949_v62 }
 0x1f0   :  { %v2335_v46 = vpop.eup %2334  ;;  %1185 = vadd.xlane.f32.xlu0 %v1184_v58  ;;  %v3217_v14 = vpop.f32.mrf.mxu0  ;;  %2344 = vtanh.f32 %v3189_v11 }
 0x1f1   :  { %v1590_v5 = vld [vmem:[#allocation1] sm:$0xff]  ;;  %v3230_v10 = vpop.f32.mrf.mxu2  ;;  %2346 = vtanh.f32 %v3199_v42 }
 0x1f2   :  { %1591 = vst [vmem:[#allocation1] ss:$9 sm:$0xff] %v1322_v6  ;;  %v1339_v6 = vperm.slane %v1218_v27, 1 }
 0x1f3   :  { %1592 = vst [vmem:[#allocation1 + $0x1] ss:$9 sm:$0xff] %v1323_v0  ;;  %v1340_v0 = vperm.slane %v1218_v27, 2 }
 0x1f4   :  { %1593 = vst [vmem:[#allocation1 + $0x2] ss:$9 sm:$0xff] %v1324_v43  ;;  %v1088_v43 = vmul.f32 %v2335_v46, %v2966_v47 }
 0x1f5   :  { %1594 = vst [vmem:[#allocation1 + $0x3] ss:$9 sm:$0xff] %v1325_v8  ;;  %v1089_v8 = vmul.f32 %v2333_v38, %v2968_v48  ;;  %v3224_v16 = vpop.f32.mrf.mxu3 }
 0x1f6   :  { %1595 = vst [vmem:[#allocation1 + $0x4] ss:$9 sm:$0xff] %v1326_v19 }
 0x1f7   :  { %1596 = vst [vmem:[#allocation1 + $0x5] ss:$9 sm:$0xff] %v1327_v1  ;;  %v1172_v1 = vadd.f32 %v1089_v8, %v1088_v43 }
 0x1f8   :  { %1597 = vst [vmem:[#allocation1 + $0x6] ss:$9 sm:$0xff] %v1328_v12  ;;  %v1343_v12 = vperm.slane %v1218_v27, 5 }
 0x1f9   :  { %1598 = vst [vmem:[#allocation1 + $0x7] ss:$9 sm:$0xff] %v1329_v23  ;;  %v1345_v23 = vperm.slane %v1218_v27, 7 }
 0x1fd   :  { %v3235_v54 = vpop.f32.mrf.mxu3 }
 0x200   :  { %v3194_v33 = vld [vmem:[#allocation1] sm:$0xff] }
 0x201   :  { %1600 = vst [vmem:[#allocation1] ss:$9 sm:$0xff] %v1330_v51 }
 0x202   :  { %1601 = vst [vmem:[#allocation1 + $0x1] ss:$9 sm:$0xff] %v1331_v56  ;;  %v1349_v56 = vperm.slane %v1219_v55, 3 }
 0x203   :  { %1602 = vst [vmem:[#allocation1 + $0x2] ss:$9 sm:$0xff] %v1332_v13  ;;  %v1350_v13 = vperm.slane %v1219_v55, 4 }
 0x204   :  { %1603 = vst [vmem:[#allocation1 + $0x3] ss:$9 sm:$0xff] %v1333_v57  ;;  %v3221_v57 = vpop.f32.mrf.mxu1 }
 0x205   :  { %1604 = vst [vmem:[#allocation1 + $0x4] ss:$9 sm:$0xff] %v1334_v20  ;;  %v1352_v20 = vperm.slane %v1219_v55, 6  ;;  %v743_v55 = vpop.f32.mrf.mxu3 }
 0x206   :  { %1605 = vst [vmem:[#allocation1 + $0x5] ss:$9 sm:$0xff] %v1335_v21  ;;  %v1144_v21 = vpop.xlane.xlu1 %1143 }
 0x207   :  { %1606 = vst [vmem:[#allocation1 + $0x6] ss:$9 sm:$0xff] %v1336_v18  ;;  %v1220_v35 = vadd.f32 %v3086_v15, %v1144_v21  ;;  %v2337_v18 = vpop.eup %2336 }
 0x208   :  { %1607 = vst [vmem:[#allocation1 + $0x7] ss:$9 sm:$0xff] %v1337_v24  ;;  %1841 = vperm.xlu1 %2115, %v1590_v5   ;;  %v1341_v5 = vperm.slane %v1218_v27, 3  ;;  %v856_v24 = vpop.f32.mrf.mxu0  ;;  %v2339_v30 = vpop.eup %2338  ;;  %v1092_v38 = vmul.f32 %v2337_v18, %v2966_v47 }
 0x209   :  { %v857_v7 = vadd.f32 %v856_v24, %v2948_v49  ;;  %v2341_v61 = vpop.eup %2340  ;;  %v1354_v36 = vperm.slane %v1220_v35, 0  ;;  %v1355_v41 = vperm.slane %v1220_v35, 1  ;;  %v1356_v28 = vperm.slane %v1220_v35, 2 }
 0x20a   :  { %v2343_v32 = vpop.eup %2342  ;;  %v1094_v46 = vmul.f32 %v2341_v61, %v2966_v47  ;;  %v1095_v58 = vmul.f32 %v2339_v30, %v2968_v48 }
 0x20b   :  { %v1093_v43 = vmul.f32 %v2343_v32, %v2968_v48 }
 0x20c   :  { %v969_v50 = vpop.f32.mrf.mxu1  ;;  %v3243_v8 = vadd.f32 %v1095_v58, %v1094_v46 }
 0x20d   :  { %v3232_v27 = vadd.f32 %v969_v50, %v857_v7 }
 0x20f   :  { %v3205_v19 = vld [vmem:[#allocation1] sm:$0xff] }
 0x210   :  { %1609 = vst [vmem:[#allocation1] ss:$9 sm:$0xff] %v1338_v37 }
 0x211   :  { %1610 = vst [vmem:[#allocation1 + $0x1] ss:$9 sm:$0xff] %v1339_v6  ;;  %1173 = vadd.xlane.f32.xlu2 %v1172_v1  ;;  %v1357_v6 = vperm.slane %v1220_v35, 3  ;;  %v1361_v1 = vperm.slane %v1220_v35, 7 }
 0x212   :  { %1611 = vst [vmem:[#allocation1 + $0x2] ss:$9 sm:$0xff] %v1340_v0  ;;  %v1358_v0 = vperm.slane %v1220_v35, 4 }
 0x213   :  { %1612 = vst [vmem:[#allocation1 + $0x3] ss:$9 sm:$0xff] %v1341_v5  ;;  %v1360_v5 = vperm.slane %v1220_v35, 6 }
 0x214   :  { %1613 = vst [vmem:[#allocation1 + $0x4] ss:$9 sm:$0xff] %v1342_v44  ;;  %v1178_v44 = vadd.f32 %v1093_v43, %v1092_v38 }
 0x215   :  { %1614 = vst [vmem:[#allocation1 + $0x5] ss:$9 sm:$0xff] %v1343_v12  ;;  %v1147_v12 = vpop.xlane.xlu2 %1146 }
 0x216   :  { %1615 = vst [vmem:[#allocation1 + $0x6] ss:$9 sm:$0xff] %v1344_v9  ;;  %v630_v9 = vpop.f32.mrf.mxu2  ;;  %v1221_v22 = vadd.f32 %v3086_v15, %v1147_v12 }
 0x217   :  { %1616 = vst [vmem:[#allocation1 + $0x7] ss:$9 sm:$0xff] %v1345_v23  ;;  %v631_v23 = vadd.f32 %v630_v9, %v2955_v29 }
 0x218   :  { %v1363_v45 = vperm.slane %v1221_v22, 1  ;;  %v1364_v52 = vperm.slane %v1221_v22, 2  ;;  %v1368_v62 = vperm.slane %v1221_v22, 6 }
 0x219   :  { %v744_v60 = vadd.f32 %v743_v55, %v631_v23 }
 0x21e   :  { %v1617_v51 = vld [vmem:[#allocation1] sm:$0xff] }
 0x21f   :  { %1618 = vst [vmem:[#allocation1] ss:$9 sm:$0xff] %v1346_v59  ;;  %1850 = vperm.xlu0 %2114, %v1617_v51   ;;  %v851_v59 = vadd.f32 %v3207_v31, %v2948_v49  ;;  %v1365_v51 = vperm.slane %v1221_v22, 3  ;;  %v2345_v31 = vpop.eup %2344 }
 0x220   :  { %1619 = vst [vmem:[#allocation1 + $0x1] ss:$9 sm:$0xff] %v1347_v17  ;;  %v1362_v17 = vperm.slane %v1221_v22, 0  ;;  %v2347_v42 = vpop.eup %2346 }
 0x221   :  { %1620 = vst [vmem:[#allocation1 + $0x2] ss:$9 sm:$0xff] %v1348_v34 }
 0x222   :  { %1621 = vst [vmem:[#allocation1 + $0x3] ss:$9 sm:$0xff] %v1349_v56  ;;  %v964_v56 = vadd.f32 %v3209_v25, %v851_v59  ;;  %v1100_v25 = vmul.f32 %v2347_v42, %v2966_v47  ;;  %v619_v59 = vadd.f32 %v3185_v26, %v2955_v29 }
 0x223   :  { %1622 = vst [vmem:[#allocation1 + $0x4] ss:$9 sm:$0xff] %v1350_v13  ;;  %v1366_v13 = vperm.slane %v1221_v22, 4 }
 0x224   :  { %1623 = vst [vmem:[#allocation1 + $0x5] ss:$9 sm:$0xff] %v1351_v40  ;;  %v1367_v40 = vperm.slane %v1221_v22, 5  ;;  %2348 = vtanh.f32 %v964_v56 }
 0x225   :  { %1624 = vst [vmem:[#allocation1 + $0x6] ss:$9 sm:$0xff] %v1352_v20  ;;  %v1369_v20 = vperm.slane %v1221_v22, 7 }
 0x226   :  { %1625 = vst [vmem:[#allocation1 + $0x7] ss:$9 sm:$0xff] %v1353_v53  ;;  %v1101_v53 = vmul.f32 %v2345_v31, %v2968_v48 }
 0x228   :  { %v3261_v21 = vadd.f32 %v1101_v53, %v1100_v25 }
 0x229   :  { %1838 = vperm.xlu2 %2113, %v3168_v39   ;;  %v1359_v39 = vperm.slane %v1220_v35, 5 }
 0x22a   :  { %v2349_v35 = vpop.eup %2348 }
 0x22b   :  { %v1103_v32 = vmul.f32 %v2349_v35, %v2968_v48 }
 0x22d   :  { %v3240_v37 = vld [vmem:[#allocation1] sm:$0xff] }
 0x22e   :  { %1627 = vst [vmem:[#allocation1] ss:$9 sm:$0xff] %v1354_v36 }
 0x22f   :  { %1628 = vst [vmem:[#allocation1 + $0x1] ss:$9 sm:$0xff] %v1355_v41 }
 0x230   :  { %1629 = vst [vmem:[#allocation1 + $0x2] ss:$9 sm:$0xff] %v1356_v28 }
 0x231   :  { %1630 = vst [vmem:[#allocation1 + $0x3] ss:$9 sm:$0xff] %v1357_v6  ;;  %1844 = vperm.xlu2 %2113, %v3194_v33   ;;  %v625_v33 = vadd.f32 %v3219_v2, %v2955_v29  ;;  %v1150_v2 = vpop.xlane.xlu0 %1149  ;;  %v1153_v6 = vpop.xlane.xlu1 %1152 }
 0x232   :  { %1631 = vst [vmem:[#allocation1 + $0x4] ss:$9 sm:$0xff] %v1358_v0  ;;  %1179 = vadd.xlane.f32.xlu1 %v1178_v44 }
 0x233   :  { %1632 = vst [vmem:[#allocation1 + $0x5] ss:$9 sm:$0xff] %v1359_v39  ;;  %v738_v11 = vadd.f32 %v3224_v16, %v625_v33  ;;  %v1222_v16 = vadd.f32 %v3086_v15, %v1150_v2  ;;  %v1156_v33 = vpop.xlane.xlu2 %1155 }
 0x234   :  { %1633 = vst [vmem:[#allocation1 + $0x6] ss:$9 sm:$0xff] %v1360_v5 }
 0x235   :  { %1634 = vst [vmem:[#allocation1 + $0x7] ss:$9 sm:$0xff] %v1361_v1  ;;  %2350 = vtanh.f32 %v738_v11  ;;  %v1370_v24 = vperm.slane %v1222_v16, 0  ;;  %v1371_v30 = vperm.slane %v1222_v16, 1  ;;  %v1372_v7 = vperm.slane %v1222_v16, 2 }
 0x236   :  { %v1373_v50 = vperm.slane %v1222_v16, 3  ;;  %v1374_v41 = vperm.slane %v1222_v16, 4  ;;  %v1375_v28 = vperm.slane %v1222_v16, 5  ;;  %v1376_v46 = vperm.slane %v1222_v16, 6 }
 0x237   :  { %v1377_v58 = vperm.slane %v1222_v16, 7  ;;  %2352 = vtanh.f32 %v3232_v27 }
 0x238   :  { %2354 = vtanh.f32 %v744_v60 }
 0x239   :  { %v1159_v2 = vpop.xlane.xlu0 %1158  ;;  %v1162_v25 = vpop.xlane.xlu1 %1161 }
 0x23a   :  { %v1225_v35 = vadd.f32 %v3086_v15, %v1159_v2 }
 0x23b   :  { %v2351_v18 = vpop.eup %2350 }
 0x23c   :  { %v3254_v34 = vld [vmem:[#allocation1] sm:$0xff]  ;;  %v1102_v36 = vmul.f32 %v2351_v18, %v2966_v47 }
 0x23d   :  { %1636 = vst [vmem:[#allocation1] ss:$9 sm:$0xff] %v1362_v17  ;;  %v2353_v0 = vpop.eup %2352 }
 0x23e   :  { %1637 = vst [vmem:[#allocation1 + $0x1] ss:$9 sm:$0xff] %v1363_v45  ;;  %v1193_v38 = vadd.f32 %v1103_v32, %v1102_v36  ;;  %v2355_v39 = vpop.eup %2354  ;;  %v1107_v23 = vmul.f32 %v2353_v0, %v2968_v48  ;;  %v732_v45 = vadd.f32 %v3191_v63, %v619_v59 }
 0x23f   :  { %1638 = vst [vmem:[#allocation1 + $0x2] ss:$9 sm:$0xff] %v1364_v52  ;;  %v1106_v27 = vmul.f32 %v2355_v39, %v2966_v47  ;;  %v1224_v52 = vadd.f32 %v3086_v15, %v1156_v33  ;;  %v1226_v33 = vadd.f32 %v3086_v15, %v1162_v25 }
 0x240   :  { %1639 = vst [vmem:[#allocation1 + $0x3] ss:$9 sm:$0xff] %v1365_v51  ;;  %2356 = vtanh.f32 %v732_v45 }
 0x241   :  { %1640 = vst [vmem:[#allocation1 + $0x4] ss:$9 sm:$0xff] %v1366_v13  ;;  %v3273_v60 = vadd.f32 %v1107_v23, %v1106_v27  ;;  %v1386_v56 = vperm.slane %v1224_v52, 0  ;;  %v1387_v26 = vperm.slane %v1224_v52, 1  ;;  %v1388_v13 = vperm.slane %v1224_v52, 2 }
 0x242   :  { %1641 = vst [vmem:[#allocation1 + $0x5] ss:$9 sm:$0xff] %v1367_v40  ;;  %v1389_v40 = vperm.slane %v1224_v52, 3  ;;  %v1390_v31 = vperm.slane %v1224_v52, 4  ;;  %v1392_v63 = vperm.slane %v1224_v52, 6  ;;  %v1393_v42 = vperm.slane %v1224_v52, 7 }
 0x243   :  { %1642 = vst [vmem:[#allocation1 + $0x6] ss:$9 sm:$0xff] %v1368_v62  ;;  %v1399_v27 = vperm.slane %v1225_v35, 5  ;;  %v1402_v45 = vperm.slane %v1226_v33, 0  ;;  %v1409_v2 = vperm.slane %v1226_v33, 7 }
 0x244   :  { %1643 = vst [vmem:[#allocation1 + $0x7] ss:$9 sm:$0xff] %v1369_v20  ;;  %v1921_v20 = vlaneseq }
 0x246   :  { %v2357_v62 = vpop.eup %2356  ;;  %v3286_v16 = vand.u32 127, %v1921_v20 }
 0x247   :  { %v1098_v53 = vmul.f32 %v2357_v62, %v2966_v47 }
 0x249   :  { %1194 = vadd.xlane.f32.xlu0 %v1193_v38  ;;  %v1395_v38 = vperm.slane %v1225_v35, 1 }
 0x24b   :  { %v1644_v61 = vld [vmem:[#allocation1] sm:$0xff]  ;;  %1847 = vperm.xlu1 %2115, %v3205_v19   ;;  %v1223_v19 = vadd.f32 %v3086_v15, %v1153_v6  ;;  %v1833_v6 = vpop.permute.xlu1 %1832 }
 0x24c   :  { %1645 = vst [vmem:[#allocation1] ss:$9 sm:$0xff] %v1370_v24  ;;  %v633_v24 = vpop.f32.mrf.mxu2 }
 0x24d   :  { %1646 = vst [vmem:[#allocation1 + $0x1] ss:$9 sm:$0xff] %v1371_v30  ;;  %v1378_v43 = vperm.slane %v1223_v19, 0  ;;  %v1379_v5 = vperm.slane %v1223_v19, 1  ;;  %v1380_v44 = vperm.slane %v1223_v19, 2  ;;  %v1381_v12 = vperm.slane %v1223_v19, 3  ;;  %v1827_v30 = vpop.permute.xlu2 %1826 }
 0x24e   :  { %1647 = vst [vmem:[#allocation1 + $0x2] ss:$9 sm:$0xff] %v1372_v7  ;;  %v1382_v9 = vperm.slane %v1223_v19, 4  ;;  %v1383_v22 = vperm.slane %v1223_v19, 5  ;;  %v1384_v55 = vperm.slane %v1223_v19, 6  ;;  %v1385_v17 = vperm.slane %v1223_v19, 7 }
 0x24f   :  { %1648 = vst [vmem:[#allocation1 + $0x3] ss:$9 sm:$0xff] %v1373_v50  ;;  %v859_v50 = vpop.f32.mrf.mxu0  ;;  %v634_v36 = vadd.f32 %v633_v24, %v2955_v29  ;;  %v1923_v32 = vperm.slane %v1827_v30, %v3286_v16 }
 0x250   :  { %1649 = vst [vmem:[#allocation1 + $0x4] ss:$9 sm:$0xff] %v1374_v41  ;;  %v1394_v41 = vperm.slane %v1225_v35, 0  ;;  %v860_v19 = vadd.f32 %v859_v50, %v2948_v49 }
 0x251   :  { %1650 = vst [vmem:[#allocation1 + $0x5] ss:$9 sm:$0xff] %v1375_v28  ;;  %v1830_v28 = vpop.permute.xlu0 %1829 }
 0x252   :  { %1651 = vst [vmem:[#allocation1 + $0x6] ss:$9 sm:$0xff] %v1376_v46 }
 0x253   :  { %1652 = vst [vmem:[#allocation1 + $0x7] ss:$9 sm:$0xff] %v1377_v58  ;;  %v3298_v58 = vadd.s32 4294967280, %v3286_v16 }
 0x25a   :  { %v3268_v1 = vld [vmem:[#allocation1] sm:$0xff]  ;;  %1182 = vadd.xlane.f32.xlu2 %v3243_v8  ;;  %v845_v8 = vadd.f32 %v3175_v3, %v2948_v49  ;;  %v1391_v3 = vperm.slane %v1224_v52, 5  ;;  %v1403_v52 = vperm.slane %v1226_v33, 1 }
 0x25b   :  { %1654 = vst [vmem:[#allocation1] ss:$9 sm:$0xff] %v1378_v43  ;;  %v1397_v43 = vperm.slane %v1225_v35, 3 }
 0x25c   :  { %1655 = vst [vmem:[#allocation1 + $0x1] ss:$9 sm:$0xff] %v1379_v5  ;;  %v958_v51 = vadd.f32 %v3177_v4, %v845_v8  ;;  %v1929_v5 = vperm.slane %v1833_v6, %v3298_v58 }
 0x25d   :  { %1656 = vst [vmem:[#allocation1 + $0x2] ss:$9 sm:$0xff] %v1380_v44  ;;  %1859 = vperm.xlu0 %2114, %v1644_v61   ;;  %v3292_v61 = vadd.s32 4294967288, %v3286_v16  ;;  %v746_v44 = vpop.f32.mrf.mxu3 }
 0x25e   :  { %1657 = vst [vmem:[#allocation1 + $0x3] ss:$9 sm:$0xff] %v1381_v12  ;;  %2358 = vtanh.f32 %v958_v51  ;;  %v1398_v12 = vperm.slane %v1225_v35, 4 }
 0x25f   :  { %1658 = vst [vmem:[#allocation1 + $0x4] ss:$9 sm:$0xff] %v1382_v9  ;;  %v1925_v46 = vperm.slane %v1830_v28, %v3292_v61  ;;  %v747_v9 = vadd.f32 %v746_v44, %v634_v36 }
 0x260   :  { %1659 = vst [vmem:[#allocation1 + $0x5] ss:$9 sm:$0xff] %v1383_v22  ;;  %v972_v22 = vpop.f32.mrf.mxu1 }
 0x261   :  { %1660 = vst [vmem:[#allocation1 + $0x6] ss:$9 sm:$0xff] %v1384_v55  ;;  %v1927_v39 = vsel %vm1926_vm1, %v1925_v46, %v1923_v32  ;;  %v1400_v55 = vperm.slane %v1225_v35, 6  ;;  %v973_v59 = vadd.f32 %v972_v22, %v860_v19  ;;  %2360 = vtanh.f32 %v747_v9  ;;  %v1168_v46 = vpop.xlane.xlu0 %1167 }
 0x262   :  { %1661 = vst [vmem:[#allocation1 + $0x7] ss:$9 sm:$0xff] %v1385_v17  ;;  %v1931_v23 = vsel %vm1930_vm2, %v1929_v5, %v1927_v39  ;;  %v1401_v17 = vperm.slane %v1225_v35, 7  ;;  %v1228_v6 = vadd.f32 %v3086_v15, %v1168_v46  ;;  %v854_v19 = vadd.f32 %v3217_v14, %v2948_v49  ;;  %v1171_v14 = vpop.xlane.xlu1 %1170 }
 0x263   :  { %2362 = vtanh.f32 %v973_v59 }
 0x264   :  { %v2359_v4 = vpop.eup %2358  ;;  %v1419_v44 = vperm.slane %v1228_v6, 1  ;;  %v1421_v9 = vperm.slane %v1228_v6, 3 }
 0x265   :  { %v1099_v18 = vmul.f32 %v2359_v4, %v2968_v48 }
 0x267   :  { %v1187_v7 = vadd.f32 %v1099_v18, %v1098_v53  ;;  %v2361_v8 = vpop.eup %2360  ;;  %v3314_v18 = vadd.s32 4294967272, %v3286_v16 }
 0x269   :  { %v3282_v11 = vld [vmem:[#allocation1] sm:$0xff]  ;;  %v2363_v51 = vpop.eup %2362 }
 0x26a   :  { %1663 = vst [vmem:[#allocation1] ss:$9 sm:$0xff] %v1386_v56  ;;  %v1404_v56 = vperm.slane %v1226_v33, 2  ;;  %v1109_v62 = vmul.f32 %v2363_v51, %v2968_v48 }
 0x26b   :  { %1664 = vst [vmem:[#allocation1 + $0x1] ss:$9 sm:$0xff] %v1387_v26 }
 0x26c   :  { %1665 = vst [vmem:[#allocation1 + $0x2] ss:$9 sm:$0xff] %v1388_v13  ;;  %v1405_v13 = vperm.slane %v1226_v33, 3 }
 0x26d   :  { %1666 = vst [vmem:[#allocation1 + $0x3] ss:$9 sm:$0xff] %v1389_v40  ;;  %v1108_v40 = vmul.f32 %v2361_v8, %v2966_v47 }
 0x26e   :  { %1667 = vst [vmem:[#allocation1 + $0x4] ss:$9 sm:$0xff] %v1390_v31  ;;  %v1406_v31 = vperm.slane %v1226_v33, 4 }
 0x26f   :  { %1668 = vst [vmem:[#allocation1 + $0x5] ss:$9 sm:$0xff] %v1391_v3  ;;  %v1407_v3 = vperm.slane %v1226_v33, 5  ;;  %v1202_v4 = vadd.f32 %v1109_v62, %v1108_v40 }
 0x270   :  { %1669 = vst [vmem:[#allocation1 + $0x6] ss:$9 sm:$0xff] %v1392_v63  ;;  %v1408_v63 = vperm.slane %v1226_v33, 6 }
 0x271   :  { %1670 = vst [vmem:[#allocation1 + $0x7] ss:$9 sm:$0xff] %v1393_v42  ;;  %v1165_v42 = vpop.xlane.xlu2 %1164 }
 0x272   :  { %1853 = vperm.xlu2 %2113, %v3240_v37   ;;  %v1396_v37 = vperm.slane %v1225_v35, 2  ;;  %v1227_v25 = vadd.f32 %v3086_v15, %v1165_v42 }
 0x274   :  { %v1410_v53 = vperm.slane %v1227_v25, 0  ;;  %v1411_v35 = vperm.slane %v1227_v25, 1  ;;  %v1412_v30 = vperm.slane %v1227_v25, 2  ;;  %v1413_v50 = vperm.slane %v1227_v25, 3 }
 0x275   :  { %1188 = vadd.xlane.f32.xlu1 %v1187_v7  ;;  %v1414_v32 = vperm.slane %v1227_v25, 4  ;;  %v1416_v28 = vperm.slane %v1227_v25, 6 }
 0x278   :  { %v3301_v0 = vld [vmem:[#allocation1] sm:$0xff] }
 0x279   :  { %1672 = vst [vmem:[#allocation1] ss:$9 sm:$0xff] %v1394_v41  ;;  %v1836_v24 = vpop.permute.xlu2 %1835  ;;  %v1415_v41 = vperm.slane %v1227_v25, 5 }
 0x27a   :  { %1673 = vst [vmem:[#allocation1 + $0x1] ss:$9 sm:$0xff] %v1395_v38  ;;  %v1933_v36 = vperm.slane %v1836_v24, %v3314_v18  ;;  %v1417_v38 = vperm.slane %v1227_v25, 7 }
 0x27b   :  { %1674 = vst [vmem:[#allocation1 + $0x2] ss:$9 sm:$0xff] %v1396_v37  ;;  %v628_v37 = vadd.f32 %v3230_v10, %v2955_v29  ;;  %v1423_v10 = vperm.slane %v1228_v6, 5 }
 0x27c   :  { %1675 = vst [vmem:[#allocation1 + $0x3] ss:$9 sm:$0xff] %v1397_v43  ;;  %v1418_v43 = vperm.slane %v1228_v6, 0 }
 0x27d   :  { %1676 = vst [vmem:[#allocation1 + $0x4] ss:$9 sm:$0xff] %v1398_v12  ;;  %v741_v39 = vadd.f32 %v3235_v54, %v628_v37  ;;  %v1420_v12 = vperm.slane %v1228_v6, 2  ;;  %v1229_v54 = vadd.f32 %v3086_v15, %v1171_v14 }
 0x27e   :  { %1677 = vst [vmem:[#allocation1 + $0x5] ss:$9 sm:$0xff] %v1399_v27  ;;  %v1422_v27 = vperm.slane %v1228_v6, 4 }
 0x27f   :  { %1678 = vst [vmem:[#allocation1 + $0x6] ss:$9 sm:$0xff] %v1400_v55  ;;  %2364 = vtanh.f32 %v741_v39  ;;  %v1426_v55 = vperm.slane %v1229_v54, 0  ;;  %v1427_v59 = vperm.slane %v1229_v54, 1  ;;  %v1428_v33 = vperm.slane %v1229_v54, 2 }
 0x280   :  { %1679 = vst [vmem:[#allocation1 + $0x7] ss:$9 sm:$0xff] %v1401_v17  ;;  %v1430_v51 = vperm.slane %v1229_v54, 4  ;;  %v1432_v40 = vperm.slane %v1229_v54, 6 }
 0x285   :  { %v2365_v22 = vpop.eup %2364 }
 0x286   :  { %v1104_v17 = vmul.f32 %v2365_v22, %v2966_v47 }
 0x287   :  { %v3307_v26 = vld [vmem:[#allocation1] sm:$0xff]  ;;  %1203 = vadd.xlane.f32.xlu0 %v1202_v4  ;;  %v3342_v4 = vadd.s32 4294967264, %v3286_v16 }
 0x288   :  { %1681 = vst [vmem:[#allocation1] ss:$9 sm:$0xff] %v1402_v45  ;;  %v1429_v45 = vperm.slane %v1229_v54, 3 }
 0x289   :  { %1682 = vst [vmem:[#allocation1 + $0x1] ss:$9 sm:$0xff] %v1403_v52 }
 0x28a   :  { %1683 = vst [vmem:[#allocation1 + $0x2] ss:$9 sm:$0xff] %v1404_v56  ;;  %v1431_v56 = vperm.slane %v1229_v54, 5 }
 0x28b   :  { %1684 = vst [vmem:[#allocation1 + $0x3] ss:$9 sm:$0xff] %v1405_v13 }
 0x28c   :  { %1685 = vst [vmem:[#allocation1 + $0x4] ss:$9 sm:$0xff] %v1406_v31  ;;  %v1174_v31 = vpop.xlane.xlu2 %1173 }
 0x28d   :  { %1686 = vst [vmem:[#allocation1 + $0x5] ss:$9 sm:$0xff] %v1407_v3  ;;  %v1433_v3 = vperm.slane %v1229_v54, 7  ;;  %v1230_v62 = vadd.f32 %v3086_v15, %v1174_v31 }
 0x28e   :  { %1687 = vst [vmem:[#allocation1 + $0x6] ss:$9 sm:$0xff] %v1408_v63  ;;  %1856 = vperm.xlu1 %2115, %v3254_v34   ;;  %v3320_v34 = vsel %vm1934_vm3, %v1933_v36, %v1931_v23  ;;  %v1425_v23 = vperm.slane %v1228_v6, 7  ;;  %v3339_v63 = vadd.s32 4294967256, %v3286_v16 }
 0x28f   :  { %1688 = vst [vmem:[#allocation1 + $0x7] ss:$9 sm:$0xff] %v1409_v2  ;;  %v1434_v42 = vperm.slane %v1230_v62, 0  ;;  %v1435_v2 = vperm.slane %v1230_v62, 1  ;;  %v1437_v24 = vperm.slane %v1230_v62, 3  ;;  %v1438_v36 = vperm.slane %v1230_v62, 4 }
 0x294   :  { %v1839_v25 = vpop.permute.xlu2 %1838 }
 0x296   :  { %v3316_v7 = vld [vmem:[#allocation1] sm:$0xff] }
 0x297   :  { %1690 = vst [vmem:[#allocation1] ss:$9 sm:$0xff] %v1410_v53  ;;  %v1436_v53 = vperm.slane %v1230_v62, 2 }
 0x298   :  { %1691 = vst [vmem:[#allocation1 + $0x1] ss:$9 sm:$0xff] %v1411_v35 }
 0x299   :  { %1692 = vst [vmem:[#allocation1 + $0x2] ss:$9 sm:$0xff] %v1412_v30  ;;  %v1937_v30 = vperm.slane %v1839_v25, %v3342_v4 }
 0x29a   :  { %1693 = vst [vmem:[#allocation1 + $0x3] ss:$9 sm:$0xff] %v1413_v50 }
 0x29b   :  { %1694 = vst [vmem:[#allocation1 + $0x4] ss:$9 sm:$0xff] %v1414_v32  ;;  %1191 = vadd.xlane.f32.xlu2 %v3261_v21  ;;  %1868 = vperm.xlu0 %2114, %v3301_v0   ;;  %v967_v21 = vadd.f32 %v3221_v57, %v854_v19  ;;  %v1424_v0 = vperm.slane %v1228_v6, 6  ;;  %v1439_v32 = vperm.slane %v1230_v62, 5  ;;  %v1441_v6 = vperm.slane %v1230_v62, 7 }
 0x29c   :  { %1695 = vst [vmem:[#allocation1 + $0x5] ss:$9 sm:$0xff] %v1415_v41  ;;  %v1939_v41 = vsel %vm1938_vm4, %v1937_v30, %v3320_v34  ;;  %v1845_v19 = vpop.permute.xlu2 %1844 }
 0x29d   :  { %1696 = vst [vmem:[#allocation1 + $0x6] ss:$9 sm:$0xff] %v1416_v28  ;;  %2366 = vtanh.f32 %v967_v21  ;;  %v1440_v28 = vperm.slane %v1230_v62, 6 }
 0x29e   :  { %1697 = vst [vmem:[#allocation1 + $0x7] ss:$9 sm:$0xff] %v1417_v38  ;;  %v3351_v38 = vadd.s32 4294967248, %v3286_v16 }
 0x2a0   :  { %v1945_v39 = vperm.slane %v1845_v19, %v3351_v38 }
 0x2a3   :  { %v2367_v57 = vpop.eup %2366 }
 0x2a4   :  { %v1105_v52 = vmul.f32 %v2367_v57, %v2968_v48  ;;  %v636_v57 = vpop.f32.mrf.mxu2 }
 0x2a5   :  { %v1698_v5 = vld [vmem:[#allocation1] sm:$0xff] }
 0x2a6   :  { %1699 = vst [vmem:[#allocation1] ss:$9 sm:$0xff] %v1418_v43  ;;  %1877 = vperm.xlu0 %2114, %v1698_v5   ;;  %v1196_v13 = vadd.f32 %v1105_v52, %v1104_v17  ;;  %v1177_v43 = vpop.xlane.xlu0 %1176 }
 0x2a7   :  { %1700 = vst [vmem:[#allocation1 + $0x1] ss:$9 sm:$0xff] %v1419_v44  ;;  %v1231_v5 = vadd.f32 %v3086_v15, %v1177_v43  ;;  %v3358_v44 = vadd.s32 4294967240, %v3286_v16 }
 0x2a8   :  { %1701 = vst [vmem:[#allocation1 + $0x2] ss:$9 sm:$0xff] %v1420_v12 }
 0x2a9   :  { %1702 = vst [vmem:[#allocation1 + $0x3] ss:$9 sm:$0xff] %v1421_v9  ;;  %v1442_v21 = vperm.slane %v1231_v5, 0  ;;  %v1443_v9 = vperm.slane %v1231_v5, 1  ;;  %v1445_v14 = vperm.slane %v1231_v5, 3  ;;  %v1446_v54 = vperm.slane %v1231_v5, 4 }
 0x2aa   :  { %1703 = vst [vmem:[#allocation1 + $0x4] ss:$9 sm:$0xff] %v1422_v27  ;;  %v1447_v22 = vperm.slane %v1231_v5, 5 }
 0x2ab   :  { %1704 = vst [vmem:[#allocation1 + $0x5] ss:$9 sm:$0xff] %v1423_v10 }
 0x2ac   :  { %1705 = vst [vmem:[#allocation1 + $0x6] ss:$9 sm:$0xff] %v1424_v0  ;;  %v1444_v0 = vperm.slane %v1231_v5, 2  ;;  %v862_v52 = vpop.f32.mrf.mxu2 }
 0x2ad   :  { %1706 = vst [vmem:[#allocation1 + $0x7] ss:$9 sm:$0xff] %v1425_v23 }
 0x2b3   :  { %1862 = vperm.xlu2 %2113, %v3268_v1   ;;  %v1842_v1 = vpop.permute.xlu1 %1841 }
 0x2b4   :  { %v3333_v8 = vld [vmem:[#allocation1] sm:$0xff]  ;;  %v1941_v50 = vperm.slane %v1842_v1, %v3339_v63 }
 0x2b5   :  { %1708 = vst [vmem:[#allocation1] ss:$9 sm:$0xff] %v1426_v55  ;;  %v1448_v55 = vperm.slane %v1231_v5, 6 }
 0x2b6   :  { %1709 = vst [vmem:[#allocation1 + $0x1] ss:$9 sm:$0xff] %v1427_v59  ;;  %v1943_v46 = vsel %vm1942_vm5, %v1941_v50, %v1939_v41  ;;  %v1449_v59 = vperm.slane %v1231_v5, 7  ;;  %v3375_v41 = vadd.s32 4294967224, %v3286_v16 }
 0x2b7   :  { %1710 = vst [vmem:[#allocation1 + $0x2] ss:$9 sm:$0xff] %v1428_v33  ;;  %v1947_v34 = vsel %vm1946_vm6, %v1945_v39, %v1943_v46 }
 0x2b8   :  { %1711 = vst [vmem:[#allocation1 + $0x3] ss:$9 sm:$0xff] %v1429_v45  ;;  %1197 = vadd.xlane.f32.xlu1 %v1196_v13  ;;  %v1186_v13 = vpop.xlane.xlu0 %1185 }
 0x2b9   :  { %1712 = vst [vmem:[#allocation1 + $0x4] ss:$9 sm:$0xff] %v1430_v51 }
 0x2ba   :  { %1713 = vst [vmem:[#allocation1 + $0x5] ss:$9 sm:$0xff] %v1431_v56 }
 0x2bb   :  { %1714 = vst [vmem:[#allocation1 + $0x6] ss:$9 sm:$0xff] %v1432_v40  ;;  %v1180_v37 = vpop.xlane.xlu1 %1179 }
 0x2bc   :  { %1715 = vst [vmem:[#allocation1 + $0x7] ss:$9 sm:$0xff] %v1433_v3  ;;  %v863_v3 = vadd.f32 %v862_v52, %v2948_v49 }
 0x2c0   :  { %v1851_v50 = vpop.permute.xlu0 %1850 }
 0x2c3   :  { %v3344_v35 = vld [vmem:[#allocation1] sm:$0xff]  ;;  %v1848_v12 = vpop.permute.xlu1 %1847 }
 0x2c4   :  { %1717 = vst [vmem:[#allocation1] ss:$9 sm:$0xff] %v1434_v42  ;;  %v1949_v10 = vperm.slane %v1848_v12, %v3358_v44 }
 0x2c5   :  { %1718 = vst [vmem:[#allocation1 + $0x1] ss:$9 sm:$0xff] %v1435_v2  ;;  %v975_v2 = vpop.f32.mrf.mxu1 }
 0x2c6   :  { %1719 = vst [vmem:[#allocation1 + $0x2] ss:$9 sm:$0xff] %v1436_v53  ;;  %v1951_v23 = vsel %vm1950_vm7, %v1949_v10, %v1947_v34  ;;  %v976_v25 = vadd.f32 %v975_v2, %v863_v3  ;;  %v749_v53 = vpop.f32.mrf.mxu3 }
 0x2c7   :  { %1720 = vst [vmem:[#allocation1 + $0x3] ss:$9 sm:$0xff] %v1437_v24  ;;  %v3370_v24 = vadd.s32 4294967232, %v3286_v16 }
 0x2c8   :  { %1721 = vst [vmem:[#allocation1 + $0x4] ss:$9 sm:$0xff] %v1438_v36  ;;  %2368 = vtanh.f32 %v976_v25  ;;  %v3397_v25 = vadd.s32 4294967208, %v3286_v16 }
 0x2c9   :  { %1722 = vst [vmem:[#allocation1 + $0x5] ss:$9 sm:$0xff] %v1439_v32  ;;  %v1953_v36 = vperm.slane %v1851_v50, %v3370_v24 }
 0x2ca   :  { %1723 = vst [vmem:[#allocation1 + $0x6] ss:$9 sm:$0xff] %v1440_v28 }
 0x2cb   :  { %1724 = vst [vmem:[#allocation1 + $0x7] ss:$9 sm:$0xff] %v1441_v6  ;;  %v1955_v6 = vsel %vm1954_vm8, %v1953_v36, %v1951_v23 }
 0x2cd   :  { %v1183_v1 = vpop.xlane.xlu2 %1182 }
 0x2ce   :  { %v1233_v30 = vadd.f32 %v3086_v15, %v1183_v1  ;;  %v2369_v34 = vpop.eup %2368 }
 0x2cf   :  { %v1111_v10 = vmul.f32 %v2369_v34, %v2968_v48 }
 0x2d0   :  { %v1458_v32 = vperm.slane %v1233_v30, 0  ;;  %v1460_v46 = vperm.slane %v1233_v30, 2  ;;  %v1461_v19 = vperm.slane %v1233_v30, 3  ;;  %v1462_v39 = vperm.slane %v1233_v30, 4 }
 0x2d1   :  { %1865 = vperm.xlu1 %2115, %v3282_v11   ;;  %v1232_v11 = vadd.f32 %v3086_v15, %v1180_v37  ;;  %v1463_v5 = vperm.slane %v1233_v30, 5 }
 0x2d2   :  { %v1725_v27 = vld [vmem:[#allocation1] sm:$0xff] }
 0x2d3   :  { %1726 = vst [vmem:[#allocation1] ss:$9 sm:$0xff] %v1442_v21  ;;  %1886 = vperm.xlu0 %2114, %v1725_v27   ;;  %v1450_v17 = vperm.slane %v1232_v11, 0  ;;  %v1451_v33 = vperm.slane %v1232_v11, 1  ;;  %v1452_v45 = vperm.slane %v1232_v11, 2  ;;  %v1453_v56 = vperm.slane %v1232_v11, 3 }
 0x2d4   :  { %1727 = vst [vmem:[#allocation1 + $0x1] ss:$9 sm:$0xff] %v1443_v9  ;;  %v1454_v40 = vperm.slane %v1232_v11, 4  ;;  %v1455_v31 = vperm.slane %v1232_v11, 5  ;;  %v1456_v62 = vperm.slane %v1232_v11, 6  ;;  %v1457_v42 = vperm.slane %v1232_v11, 7 }
 0x2d5   :  { %1728 = vst [vmem:[#allocation1 + $0x2] ss:$9 sm:$0xff] %v1444_v0  ;;  %v1854_v28 = vpop.permute.xlu2 %1853  ;;  %v1464_v21 = vperm.slane %v1233_v30, 6  ;;  %v1465_v27 = vperm.slane %v1233_v30, 7 }
 0x2d6   :  { %1729 = vst [vmem:[#allocation1 + $0x3] ss:$9 sm:$0xff] %v1445_v14  ;;  %v1957_v43 = vperm.slane %v1854_v28, %v3375_v41 }
 0x2d7   :  { %1730 = vst [vmem:[#allocation1 + $0x4] ss:$9 sm:$0xff] %v1446_v54  ;;  %v1234_v54 = vadd.f32 %v3086_v15, %v1186_v13 }
 0x2d8   :  { %1731 = vst [vmem:[#allocation1 + $0x5] ss:$9 sm:$0xff] %v1447_v22  ;;  %v1959_v12 = vsel %vm1958_vm9, %v1957_v43, %v1955_v6  ;;  %v3387_v22 = vadd.s32 4294967216, %v3286_v16  ;;  %v3404_v6 = vadd.s32 4294967200, %v3286_v16 }
 0x2d9   :  { %1732 = vst [vmem:[#allocation1 + $0x6] ss:$9 sm:$0xff] %v1448_v55  ;;  %v1467_v55 = vperm.slane %v1234_v54, 1  ;;  %v1469_v11 = vperm.slane %v1234_v54, 3  ;;  %v1473_v52 = vperm.slane %v1234_v54, 7 }
 0x2da   :  { %1733 = vst [vmem:[#allocation1 + $0x7] ss:$9 sm:$0xff] %v1449_v59  ;;  %v1468_v59 = vperm.slane %v1234_v54, 2 }
 0x2dc   :  { %1200 = vadd.xlane.f32.xlu2 %v3273_v60  ;;  %v637_v60 = vadd.f32 %v636_v57, %v2955_v29  ;;  %v1459_v29 = vperm.slane %v1233_v30, 1  ;;  %v1466_v57 = vperm.slane %v1234_v54, 0 }
 0x2de   :  { %v750_v49 = vadd.f32 %v749_v53, %v637_v60 }
 0x2e0   :  { %2370 = vtanh.f32 %v750_v49 }
 0x2e1   :  { %v3365_v51 = vld [vmem:[#allocation1] sm:$0xff] }
 0x2e2   :  { %1735 = vst [vmem:[#allocation1] ss:$9 sm:$0xff] %v1450_v17  ;;  %v1470_v17 = vperm.slane %v1234_v54, 4 }
 0x2e3   :  { %1736 = vst [vmem:[#allocation1 + $0x1] ss:$9 sm:$0xff] %v1451_v33  ;;  %v1471_v33 = vperm.slane %v1234_v54, 5 }
 0x2e4   :  { %1737 = vst [vmem:[#allocation1 + $0x2] ss:$9 sm:$0xff] %v1452_v45  ;;  %v1472_v45 = vperm.slane %v1234_v54, 6 }
 0x2e5   :  { %1738 = vst [vmem:[#allocation1 + $0x3] ss:$9 sm:$0xff] %v1453_v56 }
 0x2e6   :  { %1739 = vst [vmem:[#allocation1 + $0x4] ss:$9 sm:$0xff] %v1454_v40  ;;  %v2371_v9 = vpop.eup %2370 }
 0x2e7   :  { %1740 = vst [vmem:[#allocation1 + $0x5] ss:$9 sm:$0xff] %v1455_v31  ;;  %v1110_v0 = vmul.f32 %v2371_v9, %v2966_v47 }
 0x2e8   :  { %1741 = vst [vmem:[#allocation1 + $0x6] ss:$9 sm:$0xff] %v1456_v62  ;;  %v1189_v14 = vpop.xlane.xlu1 %1188 }
 0x2e9   :  { %1742 = vst [vmem:[#allocation1 + $0x7] ss:$9 sm:$0xff] %v1457_v42  ;;  %v1205_v23 = vadd.f32 %v1111_v10, %v1110_v0  ;;  %v1235_v56 = vadd.f32 %v3086_v15, %v1189_v14 }
 0x2eb   :  { %v1474_v13 = vperm.slane %v1235_v56, 0  ;;  %v1475_v31 = vperm.slane %v1235_v56, 1  ;;  %v1476_v3 = vperm.slane %v1235_v56, 2  ;;  %v1477_v62 = vperm.slane %v1235_v56, 3 }
 0x2ec   :  { %v1478_v1 = vperm.slane %v1235_v56, 4  ;;  %v1479_v42 = vperm.slane %v1235_v56, 5  ;;  %v1480_v60 = vperm.slane %v1235_v56, 6  ;;  %v1481_v2 = vperm.slane %v1235_v56, 7 }
 0x2f0   :  { %v3378_v37 = vld [vmem:[#allocation1] sm:$0xff] }
 0x2f1   :  { %1744 = vst [vmem:[#allocation1] ss:$9 sm:$0xff] %v1458_v32 }
 0x2f2   :  { %1745 = vst [vmem:[#allocation1 + $0x1] ss:$9 sm:$0xff] %v1459_v29 }
 0x2f3   :  { %1746 = vst [vmem:[#allocation1 + $0x2] ss:$9 sm:$0xff] %v1460_v46 }
 0x2f4   :  { %1747 = vst [vmem:[#allocation1 + $0x3] ss:$9 sm:$0xff] %v1461_v19  ;;  %1871 = vperm.xlu2 %2113, %v3307_v26  }
 0x2f5   :  { %1748 = vst [vmem:[#allocation1 + $0x4] ss:$9 sm:$0xff] %v1462_v39 }
 0x2f6   :  { %1749 = vst [vmem:[#allocation1 + $0x5] ss:$9 sm:$0xff] %v1463_v5 }
 0x2f7   :  { %1750 = vst [vmem:[#allocation1 + $0x6] ss:$9 sm:$0xff] %v1464_v21 }
 0x2f8   :  { %1751 = vst [vmem:[#allocation1 + $0x7] ss:$9 sm:$0xff] %v1465_v27 }
 0x2fb   :  { %1206 = vadd.xlane.f32.xlu1 %v1205_v23 }
 0x2fc   :  { %1880 = vperm.xlu2 %2113, %v3333_v8  }
 0x2ff   :  { %v1752_v48 = vld [vmem:[#allocation1] sm:$0xff] }
 0x300   :  { %1753 = vst [vmem:[#allocation1] ss:$9 sm:$0xff] %v1466_v57  ;;  %1895 = vperm.xlu0 %2114, %v1752_v48   ;;  %v1857_v26 = vpop.permute.xlu1 %1856  ;;  %v3410_v48 = vadd.s32 4294967192, %v3286_v16 }
 0x301   :  { %1754 = vst [vmem:[#allocation1 + $0x1] ss:$9 sm:$0xff] %v1467_v55  ;;  %v1961_v47 = vperm.slane %v1857_v26, %v3387_v22 }
 0x302   :  { %1755 = vst [vmem:[#allocation1 + $0x2] ss:$9 sm:$0xff] %v1468_v59 }
 0x303   :  { %1756 = vst [vmem:[#allocation1 + $0x3] ss:$9 sm:$0xff] %v1469_v11  ;;  %v1963_v8 = vsel %vm1962_vm10, %v1961_v47, %v1959_v12 }
 0x304   :  { %1757 = vst [vmem:[#allocation1 + $0x4] ss:$9 sm:$0xff] %v1470_v17  ;;  %1889 = vperm.xlu2 %2113, %v3365_v51   ;;  %v1195_v51 = vpop.xlane.xlu0 %1194 }
 0x305   :  { %1758 = vst [vmem:[#allocation1 + $0x5] ss:$9 sm:$0xff] %v1471_v33  ;;  %v1237_v12 = vadd.f32 %v3086_v15, %v1195_v51 }
 0x306   :  { %1759 = vst [vmem:[#allocation1 + $0x6] ss:$9 sm:$0xff] %v1472_v45 }
 0x307   :  { %1760 = vst [vmem:[#allocation1 + $0x7] ss:$9 sm:$0xff] %v1473_v52  ;;  %v1490_v21 = vperm.slane %v1237_v12, 0  ;;  %v1491_v9 = vperm.slane %v1237_v12, 1  ;;  %v1492_v10 = vperm.slane %v1237_v12, 2  ;;  %v1493_v0 = vperm.slane %v1237_v12, 3 }
 0x308   :  { %v1494_v23 = vperm.slane %v1237_v12, 4  ;;  %v1495_v54 = vperm.slane %v1237_v12, 5  ;;  %v1496_v57 = vperm.slane %v1237_v12, 6  ;;  %v1497_v55 = vperm.slane %v1237_v12, 7 }
 0x30c   :  { %v1860_v53 = vpop.permute.xlu0 %1859 }
 0x30d   :  { %v1965_v30 = vperm.slane %v1860_v53, %v3397_v25 }
 0x30e   :  { %v1761_v40 = vld [vmem:[#allocation1] sm:$0xff]  ;;  %v1192_v49 = vpop.xlane.xlu2 %1191 }
 0x30f   :  { %1762 = vst [vmem:[#allocation1] ss:$9 sm:$0xff] %v1474_v13  ;;  %1898 = vperm.xlu2 %2113, %v1761_v40   ;;  %v1236_v50 = vadd.f32 %v3086_v15, %v1192_v49  ;;  %v1967_v36 = vsel %vm1966_vm11, %v1965_v30, %v1963_v8 }
 0x310   :  { %1763 = vst [vmem:[#allocation1 + $0x1] ss:$9 sm:$0xff] %v1475_v31 }
 0x311   :  { %1764 = vst [vmem:[#allocation1 + $0x2] ss:$9 sm:$0xff] %v1476_v3  ;;  %v1483_v32 = vperm.slane %v1236_v50, 1  ;;  %v1484_v29 = vperm.slane %v1236_v50, 2  ;;  %v1485_v46 = vperm.slane %v1236_v50, 3  ;;  %v1487_v19 = vperm.slane %v1236_v50, 5 }
 0x312   :  { %1765 = vst [vmem:[#allocation1 + $0x3] ss:$9 sm:$0xff] %v1477_v62  ;;  %v1489_v43 = vperm.slane %v1236_v50, 7 }
 0x313   :  { %1766 = vst [vmem:[#allocation1 + $0x4] ss:$9 sm:$0xff] %v1478_v1 }
 0x314   :  { %1767 = vst [vmem:[#allocation1 + $0x5] ss:$9 sm:$0xff] %v1479_v42  ;;  %1874 = vperm.xlu1 %2115, %v3316_v7   ;;  %v1482_v7 = vperm.slane %v1236_v50, 0 }
 0x315   :  { %1768 = vst [vmem:[#allocation1 + $0x6] ss:$9 sm:$0xff] %v1480_v60 }
 0x316   :  { %1769 = vst [vmem:[#allocation1 + $0x7] ss:$9 sm:$0xff] %v1481_v2  ;;  %v1863_v39 = vpop.permute.xlu2 %1862 }
 0x317   :  { %v1969_v34 = vperm.slane %v1863_v39, %v3404_v6 }
 0x319   :  { %v1971_v5 = vsel %vm1970_vm12, %v1969_v34, %v1967_v36  ;;  %v1204_v36 = vpop.xlane.xlu0 %1203 }
 0x31c   :  { %1883 = vperm.xlu1 %2115, %v3344_v35   ;;  %v1486_v35 = vperm.slane %v1236_v50, 4 }
 0x31d   :  { %v1770_v28 = vld [vmem:[#allocation1] sm:$0xff] }
 0x31e   :  { %1771 = vst [vmem:[#allocation1] ss:$9 sm:$0xff] %v1482_v7  ;;  %v1240_v7 = vadd.f32 %v3086_v15, %v1204_v36 }
 0x31f   :  { %1772 = vst [vmem:[#allocation1 + $0x1] ss:$9 sm:$0xff] %v1483_v32 }
 0x320   :  { %1773 = vst [vmem:[#allocation1 + $0x2] ss:$9 sm:$0xff] %v1484_v29  ;;  %v1514_v32 = vperm.slane %v1240_v7, 0  ;;  %v1515_v29 = vperm.slane %v1240_v7, 1  ;;  %v1521_v39 = vperm.slane %v1240_v7, 7 }
 0x321   :  { %1774 = vst [vmem:[#allocation1 + $0x3] ss:$9 sm:$0xff] %v1485_v46  ;;  %v1516_v46 = vperm.slane %v1240_v7, 2 }
 0x322   :  { %1775 = vst [vmem:[#allocation1 + $0x4] ss:$9 sm:$0xff] %v1486_v35  ;;  %v1517_v35 = vperm.slane %v1240_v7, 3 }
 0x323   :  { %1776 = vst [vmem:[#allocation1 + $0x5] ss:$9 sm:$0xff] %v1487_v19  ;;  %v1518_v19 = vperm.slane %v1240_v7, 4 }
 0x324   :  { %1892 = vperm.xlu1 %2115, %v3378_v37   ;;  %v1488_v37 = vperm.slane %v1236_v50, 6  ;;  %1778 = vst [vmem:[#allocation1 + $0x7] ss:$9 sm:$0xff] %v1489_v43  ;;  %v1520_v43 = vperm.slane %v1240_v7, 6 }
 0x326   :  { %1777 = vst [vmem:[#allocation1 + $0x6] ss:$9 sm:$0xff] %v1488_v37  ;;  %v1519_v37 = vperm.slane %v1240_v7, 5 }
 0x32b   :  { %v1198_v14 = vpop.xlane.xlu1 %1197 }
 0x32c   :  { %1901 = vperm.xlu1 %2115, %v1770_v28   ;;  %v1238_v59 = vadd.f32 %v3086_v15, %v1198_v14 }
 0x32d   :  { %v1779_v27 = vld [vmem:[#allocation1] sm:$0xff] }
 0x32e   :  { %1904 = vperm.xlu0 %2114, %v1779_v27   ;;  %1780 = vst [vmem:[#allocation1] ss:$9 sm:$0xff] %v1490_v21  ;;  %v1498_v47 = vperm.slane %v1238_v59, 0  ;;  %v1499_v17 = vperm.slane %v1238_v59, 1  ;;  %v1500_v45 = vperm.slane %v1238_v59, 2  ;;  %v1501_v52 = vperm.slane %v1238_v59, 3 }
 0x32f   :  { %1781 = vst [vmem:[#allocation1 + $0x1] ss:$9 sm:$0xff] %v1491_v9  ;;  %v1502_v56 = vperm.slane %v1238_v59, 4  ;;  %v1503_v13 = vperm.slane %v1238_v59, 5  ;;  %v1504_v40 = vperm.slane %v1238_v59, 6  ;;  %v1505_v31 = vperm.slane %v1238_v59, 7 }
 0x330   :  { %1782 = vst [vmem:[#allocation1 + $0x2] ss:$9 sm:$0xff] %v1492_v10 }
 0x331   :  { %1783 = vst [vmem:[#allocation1 + $0x3] ss:$9 sm:$0xff] %v1493_v0 }
 0x332   :  { %1784 = vst [vmem:[#allocation1 + $0x4] ss:$9 sm:$0xff] %v1494_v23 }
 0x333   :  { %1785 = vst [vmem:[#allocation1 + $0x5] ss:$9 sm:$0xff] %v1495_v54 }
 0x334   :  { %1786 = vst [vmem:[#allocation1 + $0x6] ss:$9 sm:$0xff] %v1496_v57 }
 0x335   :  { %1787 = vst [vmem:[#allocation1 + $0x7] ss:$9 sm:$0xff] %v1497_v55 }
 0x33c   :  { %v1788_v8 = vld [vmem:[#allocation1] sm:$0xff] }
 0x33d   :  { %1907 = vperm.xlu2 %2113, %v1788_v8   ;;  %1789 = vst [vmem:[#allocation1] ss:$9 sm:$0xff] %v1498_v47 }
 0x33e   :  { %1790 = vst [vmem:[#allocation1 + $0x1] ss:$9 sm:$0xff] %v1499_v17 }
 0x33f   :  { %1791 = vst [vmem:[#allocation1 + $0x2] ss:$9 sm:$0xff] %v1500_v45 }
 0x340   :  { %1792 = vst [vmem:[#allocation1 + $0x3] ss:$9 sm:$0xff] %v1501_v52 }
 0x341   :  { %1793 = vst [vmem:[#allocation1 + $0x4] ss:$9 sm:$0xff] %v1502_v56 }
 0x342   :  { %1794 = vst [vmem:[#allocation1 + $0x5] ss:$9 sm:$0xff] %v1503_v13 }
 0x343   :  { %v1866_v26 = vpop.permute.xlu1 %1865  ;;  %1795 = vst [vmem:[#allocation1 + $0x6] ss:$9 sm:$0xff] %v1504_v40 }
 0x344   :  { %v1973_v11 = vperm.slane %v1866_v26, %v3410_v48  ;;  %1796 = vst [vmem:[#allocation1 + $0x7] ss:$9 sm:$0xff] %v1505_v31 }
 0x346   :  { %v3415_v33 = vsel %vm1974_vm13, %v1973_v11, %v1971_v5 }
 0x34b   :  { %v1797_v2 = vld [vmem:[#allocation1] sm:$0xff] }
 0x34c   :  { %1910 = vperm.xlu1 %2115, %v1797_v2  }
 0x34f   :  { %v1201_v3 = vpop.xlane.xlu2 %1200 }
 0x350   :  { %v1239_v62 = vadd.f32 %v3086_v15, %v1201_v3 }
 0x352   :  { %v1506_v1 = vperm.slane %v1239_v62, 0  ;;  %v1507_v42 = vperm.slane %v1239_v62, 1  ;;  %v1508_v60 = vperm.slane %v1239_v62, 2  ;;  %v1509_v51 = vperm.slane %v1239_v62, 3 }
 0x353   :  { %v1510_v53 = vperm.slane %v1239_v62, 4  ;;  %v1511_v30 = vperm.slane %v1239_v62, 5  ;;  %v1512_v49 = vperm.slane %v1239_v62, 6  ;;  %v1513_v50 = vperm.slane %v1239_v62, 7 }
 0x354   :  { %1798 = vst [vmem:[#allocation1] ss:$9 sm:$0xff] %v1506_v1 }
 0x355   :  { %1799 = vst [vmem:[#allocation1 + $0x1] ss:$9 sm:$0xff] %v1507_v42 }
 0x356   :  { %1800 = vst [vmem:[#allocation1 + $0x2] ss:$9 sm:$0xff] %v1508_v60 }
 0x357   :  { %1801 = vst [vmem:[#allocation1 + $0x3] ss:$9 sm:$0xff] %v1509_v51  ;;  %v1872_v55 = vpop.permute.xlu2 %1871 }
 0x358   :  { %1802 = vst [vmem:[#allocation1 + $0x4] ss:$9 sm:$0xff] %v1510_v53 }
 0x359   :  { %1803 = vst [vmem:[#allocation1 + $0x5] ss:$9 sm:$0xff] %v1511_v30 }
 0x35a   :  { %1804 = vst [vmem:[#allocation1 + $0x6] ss:$9 sm:$0xff] %v1512_v49 }
 0x35b   :  { %1805 = vst [vmem:[#allocation1 + $0x7] ss:$9 sm:$0xff] %v1513_v50 }
 0x35f   :  { %v1881_v11 = vpop.permute.xlu2 %1880 }
 0x360   :  { %v1987_v31 = vperm.slane %v1881_v11, %v3298_v58 }
 0x362   :  { %v1806_v28 = vld [vmem:[#allocation1] sm:$0xff] }
 0x363   :  { %1913 = vperm.xlu0 %2114, %v1806_v28   ;;  %1807 = vst [vmem:[#allocation1] ss:$9 sm:$0xff] %v1514_v32 }
 0x364   :  { %1808 = vst [vmem:[#allocation1 + $0x1] ss:$9 sm:$0xff] %v1515_v29 }
 0x365   :  { %1809 = vst [vmem:[#allocation1 + $0x2] ss:$9 sm:$0xff] %v1516_v46 }
 0x366   :  { %1810 = vst [vmem:[#allocation1 + $0x3] ss:$9 sm:$0xff] %v1517_v35 }
 0x367   :  { %1811 = vst [vmem:[#allocation1 + $0x4] ss:$9 sm:$0xff] %v1518_v19  ;;  %v1890_v8 = vpop.permute.xlu2 %1889 }
 0x368   :  { %1812 = vst [vmem:[#allocation1 + $0x5] ss:$9 sm:$0xff] %v1519_v37 }
 0x369   :  { %1813 = vst [vmem:[#allocation1 + $0x6] ss:$9 sm:$0xff] %v1520_v43  ;;  %v1976_v43 = vadd.s32 4294967184, %v3286_v16 }
 0x36a   :  { %1814 = vst [vmem:[#allocation1 + $0x7] ss:$9 sm:$0xff] %v1521_v39 }
 0x36e   :  { %v1207_v34 = vpop.xlane.xlu1 %1206 }
 0x36f   :  { %v1241_v5 = vadd.f32 %v3086_v15, %v1207_v34  ;;  %v1869_v15 = vpop.permute.xlu0 %1868  ;;  %v1899_v51 = vpop.permute.xlu2 %1898 }
 0x371   :  { %v1522_v12 = vperm.slane %v1241_v5, 0  ;;  %v1523_v21 = vperm.slane %v1241_v5, 1  ;;  %v1524_v9 = vperm.slane %v1241_v5, 2  ;;  %v1525_v27 = vperm.slane %v1241_v5, 3  ;;  %v1815_v10 = vld [vmem:[#allocation1] sm:$0xff] }
 0x372   :  { %v1526_v0 = vperm.slane %v1241_v5, 4  ;;  %1916 = vperm.xlu2 %2113, %v1815_v10   ;;  %v1527_v14 = vperm.slane %v1241_v5, 5  ;;  %v1528_v23 = vperm.slane %v1241_v5, 6  ;;  %v1529_v54 = vperm.slane %v1241_v5, 7 }
 0x373   :  { %1816 = vst [vmem:[#allocation1] ss:$9 sm:$0xff] %v1522_v12 }
 0x374   :  { %1817 = vst [vmem:[#allocation1 + $0x1] ss:$9 sm:$0xff] %v1523_v21  ;;  %v1977_v21 = vperm.slane %v1869_v15, %v1976_v43 }
 0x375   :  { %1818 = vst [vmem:[#allocation1 + $0x2] ss:$9 sm:$0xff] %v1524_v9 }
 0x376   :  { %1819 = vst [vmem:[#allocation1 + $0x3] ss:$9 sm:$0xff] %v1525_v27  ;;  %v1979_v9 = vsel %vm1978_vm14, %v1977_v21, %v3415_v33 }
 0x377   :  { %1820 = vst [vmem:[#allocation1 + $0x4] ss:$9 sm:$0xff] %v1526_v0  ;;  %v1878_v26 = vpop.permute.xlu0 %1877 }
 0x378   :  { %1821 = vst [vmem:[#allocation1 + $0x5] ss:$9 sm:$0xff] %v1527_v14  ;;  %v1985_v52 = vperm.slane %v1878_v26, %v3292_v61  ;;  %v1993_v61 = vperm.slane %v1890_v8, %v3339_v63 }
 0x379   :  { %1822 = vst [vmem:[#allocation1 + $0x6] ss:$9 sm:$0xff] %v1528_v23 }
 0x37a   :  { %1823 = vst [vmem:[#allocation1 + $0x7] ss:$9 sm:$0xff] %v1529_v54 }
 0x37f   :  { %v1887_v17 = vpop.permute.xlu0 %1886 }
 0x380   :  { %v1991_v42 = vperm.slane %v1887_v17, %v3342_v4  ;;  %v1999_v4 = vperm.slane %v1899_v51, %v3370_v24 }
 0x381   :  { %v1824_v57 = vld [vmem:[#allocation1] sm:$0xff] }
 0x382   :  { %1919 = vperm.xlu1 %2115, %v1824_v57  }
 0x386   :  { %v1875_v59 = vpop.permute.xlu1 %1874 }
 0x387   :  { %v1984_v45 = vperm.slane %v1875_v59, %v3286_v16  ;;  %v1896_v3 = vpop.permute.xlu0 %1895 }
 0x388   :  { %v1997_v49 = vperm.slane %v1896_v3, %v3358_v44 }
 0x389   :  { %v1986_v56 = vsel %vm1926_vm1, %v1985_v52, %v1984_v45  ;;  %vm2021_vm1 = vcmp.lt.s32.totalorder %v1921_v20, 256 }
 0x38a   :  { %v1988_v62 = vsel %vm1930_vm2, %v1987_v31, %v1986_v56 }
 0x38e   :  { %v1884_v47 = vpop.permute.xlu1 %1883 }
 0x38f   :  { %v1989_v13 = vperm.slane %v1884_v47, %v3314_v18 }
 0x391   :  { %v1990_v1 = vsel %vm1934_vm3, %v1989_v13, %v1988_v62 }
 0x392   :  { %v1992_v60 = vsel %vm1938_vm4, %v1991_v42, %v1990_v1 }
 0x393   :  { %v1994_v53 = vsel %vm1942_vm5, %v1993_v61, %v1992_v60 }
 0x396   :  { %v1893_v40 = vpop.permute.xlu1 %1892 }
 0x397   :  { %v1995_v2 = vperm.slane %v1893_v40, %v3351_v38  ;;  %v1908_v7 = vpop.permute.xlu2 %1907 }
 0x398   :  { %v2005_v44 = vperm.slane %v1908_v7, %v3397_v25 }
 0x399   :  { %v1996_v30 = vsel %vm1946_vm6, %v1995_v2, %v1994_v53 }
 0x39a   :  { %v1998_v50 = vsel %vm1950_vm7, %v1997_v49, %v1996_v30 }
 0x39b   :  { %v2000_v38 = vsel %vm1954_vm8, %v1999_v4, %v1998_v50 }
 0x39e   :  { %v1902_v18 = vpop.permute.xlu1 %1901 }
 0x39f   :  { %v2001_v36 = vperm.slane %v1902_v18, %v3375_v41  ;;  %v1980_v41 = vadd.s32 4294967176, %v3286_v16 }
 0x3a0   :  { %v1905_v58 = vpop.permute.xlu0 %1904 }
 0x3a1   :  { %v2002_v63 = vsel %vm1958_vm9, %v2001_v36, %v2000_v38  ;;  %v2003_v29 = vperm.slane %v1905_v58, %v3387_v22  ;;  %v1981_v12 = vperm.slane %v1872_v55, %v1980_v41 }
 0x3a3   :  { %v2004_v46 = vsel %vm1962_vm10, %v2003_v29, %v2002_v63  ;;  %v1983_v16 = vsel %vm1982_vm15, %v1981_v12, %v1979_v9 }
 0x3a4   :  { %v2006_v24 = vsel %vm1966_vm11, %v2005_v44, %v2004_v46 }
 0x3be   :  { %v1911_v32 = vpop.permute.xlu1 %1910 }
 0x3bf   :  { %v2007_v35 = vperm.slane %v1911_v32, %v3404_v6 }
 0x3c1   :  { %v2008_v39 = vsel %vm1970_vm12, %v2007_v35, %v2006_v24 }
 0x3cc   :  { %v1917_v37 = vpop.permute.xlu2 %1916 }
 0x3cd   :  { %v2011_v34 = vperm.slane %v1917_v37, %v1976_v43 }
 0x3d5   :  { %v1914_v28 = vpop.permute.xlu0 %1913 }
 0x3d6   :  { %v2009_v19 = vperm.slane %v1914_v28, %v3410_v48 }
 0x3d8   :  { %v2010_v22 = vsel %vm1974_vm13, %v2009_v19, %v2008_v39 }
 0x3d9   :  { %v2012_v25 = vsel %vm1978_vm14, %v2011_v34, %v2010_v22 }
 0x3f4   :  { %v1920_v5 = vpop.permute.xlu1 %1919 }
 0x3f5   :  { %v2013_v6 = vperm.slane %v1920_v5, %v1980_v41 }
 0x3f7   :  { %v2014_v48 = vsel %vm1982_vm15, %v2013_v6, %v2012_v25 }
 0x3f8   :  { %v2015_v27 = vrot.slane %v2014_v48, 7 }
 0x3fa   :  { %v2017_v10 = vsel %vm2016_vm0, %v1983_v16, %v2015_v27 }
 0x3fb   :  { %2023 = vst.msk [vmem:[%s3461_s7] sm:$0x3] %vm2021_vm1, %v2017_v10 }

</bundles_post_ra>
